<compile_context>
chip_gen: v5e
topology: v5e:2x2
jax: 0.10.0
libtpu: 0.0.40
codegen_flags: <defaults>
</compile_context>

<pallas_src>
import functools

import numpy as np
import jax
import jax.numpy as jnp
from jax import lax
from jax.experimental import pallas as pl
from jax.experimental.pallas import tpu as pltpu

EPS = 1e-5


# ----------------------------------------------------------------------------
# One-time probe of pltpu.roll's rotation direction (run OUTSIDE jit).
# ----------------------------------------------------------------------------
def _detect_shift_mode():
    """Returns 'roll_fwd' (pltpu.roll == jnp.roll), 'roll_bwd', or 'concat'."""
    try:
        x = jnp.arange(8 * 256, dtype=jnp.float32).reshape(8, 256)

        def probe_kernel(x_ref, o_ref):
            o_ref[...] = pltpu.roll(x_ref[...], 5, axis=1)

        out = np.asarray(jax.block_until_ready(pl.pallas_call(
            probe_kernel,
            out_shape=jax.ShapeDtypeStruct((8, 256), jnp.float32))(x)))
        ref = np.asarray(x)
        if np.array_equal(out, np.roll(ref, 5, axis=1)):
            return "roll_fwd"
        if np.array_equal(out, np.roll(ref, -5, axis=1)):
            return "roll_bwd"
    except Exception:
        pass
    return "concat"


# ----------------------------------------------------------------------------
# The fused Pallas kernel (NB batch samples per grid step)
# ----------------------------------------------------------------------------
def _decoder_block_kernel(x_ref, hw_ref, w1_ref, t1_ref, wdh_ref, wdv_ref,
                          wdd_ref, t2_ref, w3_ref, t3_ref, o_ref, *,
                          H, W, M, C4, C8, F, NB, compute_dtype, shift_mode):
    """Transposed ("pixels on lanes") layout: activations are (channels, M).

       x_ref  : (NB, Cin, M)   NCHW-flattened input
       hw_ref : (2, M) f32     row 0 = h index, row 1 = w index per pixel
       w1_ref : (C4, Cin)      conv1 weight, bn1 scale folded  (compute_dtype)
       t1_ref : (C4, 1) f32    conv1 bias + bn1 shift
       wdh/wdv: (C8, 9*C4)     tap-merged horizontal / vertical weights
       wdd    : (2*C8, 9*C4)   both diagonal directions (shared slab)
       t2_ref : (4*C8, 1) f32  per-direction bias + bn2 shift (concat order)
       w3_ref : (F, 4*C8)      conv3 weight, bn3 scale folded
       t3_ref : (F, 1) f32
       o_ref  : (NB, F, M)"""
    h_idx = hw_ref[0:1, :]                                      # (1, M) f32
    w_idx = hw_ref[1:2, :]

    def shift_lanes(v, s):
        # out[:, m] = v[:, (m + s) % M]   (cyclic lane shift, XLU)
        i = s % M
        if i == 0:
            return v
        if shift_mode == "roll_fwd":       # pltpu.roll == jnp.roll semantics
            return pltpu.roll(v, M - i, axis=1)
        if shift_mode == "roll_bwd":
            return pltpu.roll(v, i, axis=1)
        return jnp.concatenate([v[:, i:], v[:, :i]], axis=1)

    def tap_mask(dh, dw, d):
        # 0/1 f32 (1, M) mask: tap (dh*d, dw*d) reads an in-bounds pixel.
        ok = None
        for idx, step, n in ((h_idx, dh, H), (w_idx, dw, W)):
            c = step * d
            if c > 0:
                cond = idx <= float(n - 1 - c)
            elif c < 0:
                cond = idx >= float(-c)
            else:
                continue
            ok = cond if ok is None else jnp.logical_and(ok, cond)
        return None if ok is None else ok.astype(jnp.float32)

    # Masks depend only on (direction, tap): compute once per grid step.
    masks = {(dh, dw): [tap_mask(dh, dw, k - 4) for k in range(9)]
             for (dh, dw) in ((0, 1), (1, 0), (1, -1))}

    def dir_slab(y, dh, dw):
        # (9*C4, M) slab: 9 shifted + masked copies of y stacked on sublanes.
        parts = []
        for k in range(9):
            v = shift_lanes(y, (dh * W + dw) * (k - 4))
            m = masks[(dh, dw)][k]
            if m is not None:
                v = v * m                                        # f32 mask mult
            parts.append(v)
        return jnp.concatenate(parts, axis=0).astype(compute_dtype)

    w1, wdh, wdv, wdd, w3 = (w1_ref[...], wdh_ref[...], wdv_ref[...],
                             wdd_ref[...], w3_ref[...])
    t1, t2, t3 = t1_ref[...], t2_ref[...], t3_ref[...]

    for b in range(NB):
        # conv1 (1x1) + bn1 + relu1
        x = x_ref[b].astype(compute_dtype)                       # (Cin, M)
        y = jnp.dot(w1, x, preferred_element_type=jnp.float32)   # (C4, M)
        y = jnp.maximum(y + t1, 0.0)

        # four directional convs as 3 wide-K matmuls (diagonals share a slab)
        z1 = jnp.dot(wdh, dir_slab(y, 0, 1),
                     preferred_element_type=jnp.float32)         # (C8, M)
        z2 = jnp.dot(wdv, dir_slab(y, 1, 0),
                     preferred_element_type=jnp.float32)         # (C8, M)
        z34 = jnp.dot(wdd, dir_slab(y, 1, -1),
                      preferred_element_type=jnp.float32)        # (2*C8, M)

        # concat (never hits HBM) + bn2 + relu2
        z = jnp.concatenate([z1, z2, z34], axis=0)               # (4*C8, M)
        z = jnp.maximum(z + t2, 0.0).astype(compute_dtype)

        # conv3 (1x1) + bn3 + relu3, single K=4*C8 matmul, lane-dense store
        out = jnp.dot(w3, z, preferred_element_type=jnp.float32)  # (F, M)
        out = jnp.maximum(out + t3, 0.0)
        o_ref[b] = out.astype(o_ref.dtype)


# ----------------------------------------------------------------------------
# Host wrapper: BN folding, tap-merged weight packing, pallas_call
# ----------------------------------------------------------------------------
def decoder_block_pallas(x, p, inp=False, compute_dtype=jnp.bfloat16,
                         shift_mode="concat", samples_per_step=1):
    N, Cin, H, W = x.shape
    assert H == W, "h/v shear transforms require square spatial dims"
    assert Cin % 8 == 0
    C4, C8 = Cin // 4, Cin // 8
    F = p["conv3_w"].shape[0]
    M = H * W
    NB = samples_per_step
    assert N % NB == 0

    # ---- fold the (inference-mode) BatchNorms into weights / biases ----
    s1 = p["g1"] * lax.rsqrt(p["v1"] + EPS)
    w1f = p["conv1_w"][:, :, 0, 0] * s1[:, None]                   # (C4, Cin)
    t1f = ((p["conv1_b"] - p["m1"]) * s1 + p["be1"])[:, None]      # (C4, 1)

    s2 = p["g2"] * lax.rsqrt(p["v2"] + EPS)                        # (4*C8,)

    def fold_dir(w_taps, s_dir):            # w_taps: (C8, C4, 9) tap-major pack
        w = jnp.transpose(w_taps, (0, 2, 1)).reshape(C8, 9 * C4)
        return w * s_dir[:, None]

    wdh = fold_dir(p["d1_w"][:, :, 0, :], s2[0 * C8:1 * C8])       # horizontal
    wdv = fold_dir(p["d2_w"][:, :, :, 0], s2[1 * C8:2 * C8])       # vertical
    wd3 = fold_dir(p["d3_w"][:, :, :, 0], s2[2 * C8:3 * C8])       # diag (h-shear)
    wd4 = fold_dir(p["d4_w"][:, :, 0, ::-1], s2[3 * C8:4 * C8])    # diag, taps rev
    wdd = jnp.concatenate([wd3, wd4], axis=0)                      # (2*C8, 9*C4)

    bcat = jnp.concatenate([p["d1_b"], p["d2_b"], p["d3_b"], p["d4_b"]])
    t2f = ((bcat - p["m2"]) * s2 + p["be2"])[:, None]              # (4*C8, 1)

    s3 = p["g3"] * lax.rsqrt(p["v3"] + EPS)
    w3f = p["conv3_w"][:, :, 0, 0] * s3[:, None]                   # (F, 4*C8)
    t3f = ((p["conv3_b"] - p["m3"]) * s3 + p["be3"])[:, None]      # (F, 1)

    hw = jnp.asarray(np.stack([np.repeat(np.arange(H), W),
                               np.tile(np.arange(W), H)], axis=0),
                     dtype=jnp.float32)                            # (2, M)

    # NCHW-flattened: channels on sublanes, pixels on lanes -> no host transpose
    x_flat = x.reshape(N, Cin, M)

    kernel = functools.partial(
        _decoder_block_kernel, H=H, W=W, M=M, C4=C4, C8=C8, F=F, NB=NB,
        compute_dtype=compute_dtype, shift_mode=shift_mode)

    out_flat = pl.pallas_call(
        kernel,
        out_shape=jax.ShapeDtypeStruct((N, F, M), jnp.float32),
        grid_spec=pltpu.PrefetchScalarGridSpec(
            num_scalar_prefetch=0,
            grid=(N // NB,),
            in_specs=[
                pl.BlockSpec((NB, Cin, M), lambda i: (i, 0, 0)),    # x
                pl.BlockSpec((2, M), lambda i: (0, 0)),             # h/w indices
                pl.BlockSpec((C4, Cin), lambda i: (0, 0)),          # w1 (folded)
                pl.BlockSpec((C4, 1), lambda i: (0, 0)),            # t1
                pl.BlockSpec((C8, 9 * C4), lambda i: (0, 0)),       # wdh
                pl.BlockSpec((C8, 9 * C4), lambda i: (0, 0)),       # wdv
                pl.BlockSpec((2 * C8, 9 * C4), lambda i: (0, 0)),   # wdd
                pl.BlockSpec((4 * C8, 1), lambda i: (0, 0)),        # t2
                pl.BlockSpec((F, 4 * C8), lambda i: (0, 0)),        # w3 (folded)
                pl.BlockSpec((F, 1), lambda i: (0, 0)),             # t3
            ],
            out_specs=pl.BlockSpec((NB, F, M), lambda i: (i, 0, 0)),
        ),
        compiler_params=pltpu.CompilerParams(
            dimension_semantics=("parallel",)),
    )(x_flat, hw,
      w1f.astype(compute_dtype), t1f.astype(jnp.float32),
      wdh.astype(compute_dtype), wdv.astype(compute_dtype),
      wdd.astype(compute_dtype), t2f.astype(jnp.float32),
      w3f.astype(compute_dtype), t3f.astype(jnp.float32))

    out = out_flat.reshape(N, F, H, W)                              # already NCHW
    if inp:
        # nearest-2x upsample commutes with the per-pixel bn2/relu2/1x1-conv3/
        # bn3/relu3 tail -> apply it to the 4x smaller final output instead of
        # materializing an upsampled `cat`.
        out = jnp.repeat(jnp.repeat(out, 2, axis=2), 2, axis=3)
    return out


# ----------------------------------------------------------------------------
# Parameters (deterministic, mimicking the module's __init__ shapes)
# ----------------------------------------------------------------------------
def init_params(key, in_channels, n_filters):
    C4, C8 = in_channels // 4, in_channels // 8
    keys = jax.random.split(key, 16)

    def kaiming(k, shape):                          # kaiming_normal_, fan_in
        fan_in = shape[1] * shape[2] * shape[3]
        return jax.random.normal(k, shape, jnp.float32) * jnp.sqrt(2.0 / fan_in)

    def bias(k, fan_in, n):
        bound = 1.0 / np.sqrt(fan_in)
        return jax.random.uniform(k, (n,), jnp.float32, -bound, bound)

    p = {
        "conv1_w": kaiming(keys[0], (C4, in_channels, 1, 1)),
        "conv1_b": bias(keys[1], in_channels, C4),
        "d1_w": kaiming(keys[2], (C8, C4, 1, 9)), "d1_b": bias(keys[3], C4 * 9, C8),
        "d2_w": kaiming(keys[4], (C8, C4, 9, 1)), "d2_b": bias(keys[5], C4 * 9, C8),
        "d3_w": kaiming(keys[6], (C8, C4, 9, 1)), "d3_b": bias(keys[7], C4 * 9, C8),
        "d4_w": kaiming(keys[8], (C8, C4, 1, 9)), "d4_b": bias(keys[9], C4 * 9, C8),
        "conv3_w": kaiming(keys[10], (n_filters, 2 * C4, 1, 1)),
        "conv3_b": bias(keys[11], 2 * C4, n_filters),
    }
    for name, c in (("1", C4), ("2", 2 * C4), ("3", n_filters)):
        p["g" + name] = jnp.ones((c,), jnp.float32)
        p["be" + name] = jnp.zeros((c,), jnp.float32)
        p["m" + name] = jnp.zeros((c,), jnp.float32)
        p["v" + name] = jnp.ones((c,), jnp.float32)
    return p


# ----------------------------------------------------------------------------
# Pure-JAX reference (lax.conv + the literal torch shear transforms)
# ----------------------------------------------------------------------------
def h_transform(x):
    N, C, H, W = x.shape
    x = jnp.pad(x, ((0, 0), (0, 0), (0, 0), (0, W)))
    x = x.reshape(N, C, -1)[..., :-W]
    return x.reshape(N, C, H, 2 * W - 1)


def inv_h_transform(x):
    N, C, H, _ = x.shape
    x = x.reshape(N, C, -1)
    x = jnp.pad(x, ((0, 0), (0, 0), (0, H)))
    x = x.reshape(N, C, H, 2 * H)
    return x[..., :H]


def v_transform(x):
    x = x.transpose(0, 1, 3, 2)
    N, C, W, H = x.shape
    x = jnp.pad(x, ((0, 0), (0, 0), (0, 0), (0, H)))
    x = x.reshape(N, C, -1)[..., :-H]
    x = x.reshape(N, C, W, 2 * H - 1)
    return x.transpose(0, 1, 3, 2)


def inv_v_transform(x):
    x = x.transpose(0, 1, 3, 2)
    N, C, W, _ = x.shape
    x = x.reshape(N, C, -1)
    x = jnp.pad(x, ((0, 0), (0, 0), (0, W)))
    x = x.reshape(N, C, W, 2 * W)
    x = x[..., :W]
    return x.transpose(0, 1, 3, 2)


def reference_forward(x, p, inp=False):
    def bn(y, g, b, m, v):
        rs = lambda a: a.reshape(1, -1, 1, 1)
        return (y - rs(m)) / jnp.sqrt(rs(v) + EPS) * rs(g) + rs(b)

    def conv(x, w, b, pad):
        y = lax.conv_general_dilated(
            x, w, (1, 1), ((pad[0], pad[0]), (pad[1], pad[1])),
            dimension_numbers=("NCHW", "OIHW", "NCHW"),
            precision=lax.Precision.HIGHEST)
        return y + b.reshape(1, -1, 1, 1)

    y = jax.nn.relu(bn(conv(x, p["conv1_w"], p["conv1_b"], (0, 0)),
                       p["g1"], p["be1"], p["m1"], p["v1"]))
    x1 = conv(y, p["d1_w"], p["d1_b"], (0, 4))
    x2 = conv(y, p["d2_w"], p["d2_b"], (4, 0))
    x3 = inv_h_transform(conv(h_transform(y), p["d3_w"], p["d3_b"], (4, 0)))
    x4 = inv_v_transform(conv(v_transform(y), p["d4_w"], p["d4_b"], (0, 4)))
    cat = jnp.concatenate([x1, x2, x3, x4], axis=1)
    if inp:
        cat = jnp.repeat(jnp.repeat(cat, 2, axis=2), 2, axis=3)
    z = jax.nn.relu(bn(cat, p["g2"], p["be2"], p["m2"], p["v2"]))
    z = conv(z, p["conv3_w"], p["conv3_b"], (0, 0))
    z = jax.nn.relu(bn(z, p["g3"], p["be3"], p["m3"], p["v3"]))
    return z


if __name__ == "__main__":
    in_channels, n_filters = 32, 16
    N, H, W = 2, 16, 16           # H == W required by the shear transforms

    key = jax.random.PRNGKey(0)
    k_x, k_p = jax.random.split(key)
    x = jax.random.normal(k_x, (N, in_channels, H, W), jnp.float32)
    params = init_params(k_p, in_channels, n_filters)

    shift_mode = _detect_shift_mode()     # probe pltpu.roll direction once

    ref = np.asarray(jax.block_until_ready(reference_forward(x, params, inp=False)))
    scale = max(1.0, float(np.max(np.abs(ref))))

    # f32-operand run: validates the lane-shift / slab-matmul reformulation
    out_f32 = jax.block_until_ready(
        jax.jit(functools.partial(decoder_block_pallas, inp=False,
                                  compute_dtype=jnp.float32,
                                  shift_mode=shift_mode))(x, params))
    assert out_f32.shape == (N, n_filters, H, W), out_f32.shape
    err32 = float(np.max(np.abs(np.asarray(out_f32) - ref)))
    assert err32 <= 2e-2 * scale, "f32 mismatch vs reference: %.3e" % err32

    # default bf16-MXU run (f32 accumulate / epilogue)
    out_bf16 = jax.block_until_ready(
        jax.jit(functools.partial(decoder_block_pallas, inp=False,
                                  compute_dtype=jnp.bfloat16,
                                  shift_mode=shift_mode))(x, params))
    errbf = float(np.max(np.abs(np.asarray(out_bf16) - ref)))
    assert errbf <= 5e-2 * scale, "bf16 mismatch vs reference: %.3e" % errbf

    # inp=True path (nearest-2x upsample)
    ref_up = np.asarray(jax.block_until_ready(reference_forward(x, params, inp=True)))
    out_up = jax.block_until_ready(
        jax.jit(functools.partial(decoder_block_pallas, inp=True,
                                  compute_dtype=jnp.float32,
                                  shift_mode=shift_mode))(x, params))
    assert out_up.shape == (N, n_filters, 2 * H, 2 * W), out_up.shape
    errup = float(np.max(np.abs(np.asarray(out_up) - ref_up)))
    assert errup <= 2e-2 * scale, "inp=True mismatch vs reference: %.3e" % errup

    print("KERNEL_OK")
</pallas_src>

<mosaic_0001>
module attributes {stable_mosaic.version = 11 : i64} {
  func.func @probe_kernel(%arg0: memref<8x256xf32, #tpu.memory_space<vmem>>, %arg1: memref<8x256xf32, #tpu.memory_space<vmem>>) attributes {dimension_semantics = [], scalar_prefetch = 0 : i64, scratch_operands = 0 : i64, tpu.core_type = #tpu.core_type<tc>} {
    %c0 = arith.constant 0 : index
    %c0_0 = arith.constant 0 : index
    %0 = vector.load %arg0[%c0, %c0_0] : memref<8x256xf32, #tpu.memory_space<vmem>>, vector<8x256xf32>
    %c5_i32 = arith.constant 5 : i32
    %1 = tpu.dynamic_rotate %0 by %c5_i32 dim 1 : vector<8x256xf32>, i32 -> vector<8x256xf32>
    %c0_1 = arith.constant 0 : index
    %c0_2 = arith.constant 0 : index
    %2 = vector.load %arg1[%c0_1, %c0_2] : memref<8x256xf32, #tpu.memory_space<vmem>>, vector<8x256xf32>
    tpu.vector_store %arg1[%c0_1, %c0_2], %1 {strides = array<i32>} : memref<8x256xf32, #tpu.memory_space<vmem>>, vector<8x256xf32>,
    return
  }
}

module attributes {stable_mosaic.version = 11 : i64} {
  func.func @_decoder_block_kernel(%arg0: i32, %arg1: memref<1x32x256xf32, #tpu.memory_space<vmem>>, %arg2: memref<2x256xf32, #tpu.memory_space<vmem>>, %arg3: memref<8x32xf32, #tpu.memory_space<vmem>>, %arg4: memref<8x1xf32, #tpu.memory_space<vmem>>, %arg5: memref<4x72xf32, #tpu.memory_space<vmem>>, %arg6: memref<4x72xf32, #tpu.memory_space<vmem>>, %arg7: memref<8x72xf32, #tpu.memory_space<vmem>>, %arg8: memref<16x1xf32, #tpu.memory_space<vmem>>, %arg9: memref<16x16xf32, #tpu.memory_space<vmem>>, %arg10: memref<16x1xf32, #tpu.memory_space<vmem>>, %arg11: memref<1x16x256xf32, #tpu.memory_space<vmem>>) attributes {dimension_semantics = [#tpu.dimension_semantics<parallel>], iteration_bounds = array<i64: 2>, scalar_prefetch = 0 : i64, scratch_operands = 0 : i64, tpu.core_type = #tpu.core_type<tc>, window_params = [{transform_indices = @transform_0, window_bounds = array<i64: 1, 32, 256>}, {pipeline_mode = #tpu.pipeline_mode<synchronous>, transform_indices = @transform_1, window_bounds = array<i64: 2, 256>}, {pipeline_mode = #tpu.pipeline_mode<synchronous>, transform_indices = @transform_2, window_bounds = array<i64: 8, 32>}, {pipeline_mode = #tpu.pipeline_mode<synchronous>, transform_indices = @transform_3, window_bounds = array<i64: 8, 1>}, {pipeline_mode = #tpu.pipeline_mode<synchronous>, transform_indices = @transform_4, window_bounds = array<i64: 4, 72>}, {pipeline_mode = #tpu.pipeline_mode<synchronous>, transform_indices = @transform_5, window_bounds = array<i64: 4, 72>}, {pipeline_mode = #tpu.pipeline_mode<synchronous>, transform_indices = @transform_6, window_bounds = array<i64: 8, 72>}, {pipeline_mode = #tpu.pipeline_mode<synchronous>, transform_indices = @transform_7, window_bounds = array<i64: 16, 1>}, {pipeline_mode = #tpu.pipeline_mode<synchronous>, transform_indices = @transform_8, window_bounds = array<i64: 16, 16>}, {pipeline_mode = #tpu.pipeline_mode<synchronous>, transform_indices = @transform_9, window_bounds = array<i64: 16, 1>}, {transform_indices = @transform_10, window_bounds = array<i64: 1, 16, 256>}]} {
    %c0 = arith.constant 0 : index
    %c0_0 = arith.constant 0 : index
    %0 = vector.load %arg2[%c0, %c0_0] : memref<2x256xf32, #tpu.memory_space<vmem>>, vector<1x256xf32>
    %c1 = arith.constant 1 : index
    %c0_1 = arith.constant 0 : index
    %1 = vector.load %arg2[%c1, %c0_1] : memref<2x256xf32, #tpu.memory_space<vmem>>, vector<1x256xf32>
    %cst = arith.constant 4.000000e+00 : f32
    %2 = vector.broadcast %cst : f32 to vector<1x256xf32>
    %3 = arith.cmpf oge, %1, %2 : vector<1x256xf32>
    %4 = arith.extui %3 : vector<1x256xi1> to vector<1x256xi32>
    %5 = arith.sitofp %4 : vector<1x256xi32> to vector<1x256xf32>
    %cst_2 = arith.constant 3.000000e+00 : f32
    %6 = vector.broadcast %cst_2 : f32 to vector<1x256xf32>
    %7 = arith.cmpf oge, %1, %6 : vector<1x256xf32>
    %8 = arith.extui %7 : vector<1x256xi1> to vector<1x256xi32>
    %9 = arith.sitofp %8 : vector<1x256xi32> to vector<1x256xf32>
    %cst_3 = arith.constant 2.000000e+00 : f32
    %10 = vector.broadcast %cst_3 : f32 to vector<1x256xf32>
    %11 = arith.cmpf oge, %1, %10 : vector<1x256xf32>
    %12 = arith.extui %11 : vector<1x256xi1> to vector<1x256xi32>
    %13 = arith.sitofp %12 : vector<1x256xi32> to vector<1x256xf32>
    %cst_4 = arith.constant 1.000000e+00 : f32
    %14 = vector.broadcast %cst_4 : f32 to vector<1x256xf32>
    %15 = arith.cmpf oge, %1, %14 : vector<1x256xf32>
    %16 = arith.extui %15 : vector<1x256xi1> to vector<1x256xi32>
    %17 = arith.sitofp %16 : vector<1x256xi32> to vector<1x256xf32>
    %cst_5 = arith.constant 1.400000e+01 : f32
    %18 = vector.broadcast %cst_5 : f32 to vector<1x256xf32>
    %19 = arith.cmpf ole, %1, %18 : vector<1x256xf32>
    %20 = arith.extui %19 : vector<1x256xi1> to vector<1x256xi32>
    %21 = arith.sitofp %20 : vector<1x256xi32> to vector<1x256xf32>
    %cst_6 = arith.constant 1.300000e+01 : f32
    %22 = vector.broadcast %cst_6 : f32 to vector<1x256xf32>
    %23 = arith.cmpf ole, %1, %22 : vector<1x256xf32>
    %24 = arith.extui %23 : vector<1x256xi1> to vector<1x256xi32>
    %25 = arith.sitofp %24 : vector<1x256xi32> to vector<1x256xf32>
    %cst_7 = arith.constant 1.200000e+01 : f32
    %26 = vector.broadcast %cst_7 : f32 to vector<1x256xf32>
    %27 = arith.cmpf ole, %1, %26 : vector<1x256xf32>
    %28 = arith.extui %27 : vector<1x256xi1> to vector<1x256xi32>
    %29 = arith.sitofp %28 : vector<1x256xi32> to vector<1x256xf32>
    %cst_8 = arith.constant 1.100000e+01 : f32
    %30 = vector.broadcast %cst_8 : f32 to vector<1x256xf32>
    %31 = arith.cmpf ole, %1, %30 : vector<1x256xf32>
    %32 = arith.extui %31 : vector<1x256xi1> to vector<1x256xi32>
    %33 = arith.sitofp %32 : vector<1x256xi32> to vector<1x256xf32>
    %cst_9 = arith.constant 4.000000e+00 : f32
    %34 = vector.broadcast %cst_9 : f32 to vector<1x256xf32>
    %35 = arith.cmpf oge, %0, %34 : vector<1x256xf32>
    %36 = arith.extui %35 : vector<1x256xi1> to vector<1x256xi32>
    %37 = arith.sitofp %36 : vector<1x256xi32> to vector<1x256xf32>
    %cst_10 = arith.constant 3.000000e+00 : f32
    %38 = vector.broadcast %cst_10 : f32 to vector<1x256xf32>
    %39 = arith.cmpf oge, %0, %38 : vector<1x256xf32>
    %40 = arith.extui %39 : vector<1x256xi1> to vector<1x256xi32>
    %41 = arith.sitofp %40 : vector<1x256xi32> to vector<1x256xf32>
    %cst_11 = arith.constant 2.000000e+00 : f32
    %42 = vector.broadcast %cst_11 : f32 to vector<1x256xf32>
    %43 = arith.cmpf oge, %0, %42 : vector<1x256xf32>
    %44 = arith.extui %43 : vector<1x256xi1> to vector<1x256xi32>
    %45 = arith.sitofp %44 : vector<1x256xi32> to vector<1x256xf32>
    %cst_12 = arith.constant 1.000000e+00 : f32
    %46 = vector.broadcast %cst_12 : f32 to vector<1x256xf32>
    %47 = arith.cmpf oge, %0, %46 : vector<1x256xf32>
    %48 = arith.extui %47 : vector<1x256xi1> to vector<1x256xi32>
    %49 = arith.sitofp %48 : vector<1x256xi32> to vector<1x256xf32>
    %cst_13 = arith.constant 1.400000e+01 : f32
    %50 = vector.broadcast %cst_13 : f32 to vector<1x256xf32>
    %51 = arith.cmpf ole, %0, %50 : vector<1x256xf32>
    %52 = arith.extui %51 : vector<1x256xi1> to vector<1x256xi32>
    %53 = arith.sitofp %52 : vector<1x256xi32> to vector<1x256xf32>
    %cst_14 = arith.constant 1.300000e+01 : f32
    %54 = vector.broadcast %cst_14 : f32 to vector<1x256xf32>
    %55 = arith.cmpf ole, %0, %54 : vector<1x256xf32>
    %56 = arith.extui %55 : vector<1x256xi1> to vector<1x256xi32>
    %57 = arith.sitofp %56 : vector<1x256xi32> to vector<1x256xf32>
    %cst_15 = arith.constant 1.200000e+01 : f32
    %58 = vector.broadcast %cst_15 : f32 to vector<1x256xf32>
    %59 = arith.cmpf ole, %0, %58 : vector<1x256xf32>
    %60 = arith.extui %59 : vector<1x256xi1> to vector<1x256xi32>
    %61 = arith.sitofp %60 : vector<1x256xi32> to vector<1x256xf32>
    %cst_16 = arith.constant 1.100000e+01 : f32
    %62 = vector.broadcast %cst_16 : f32 to vector<1x256xf32>
    %63 = arith.cmpf ole, %0, %62 : vector<1x256xf32>
    %64 = arith.extui %63 : vector<1x256xi1> to vector<1x256xi32>
    %65 = arith.sitofp %64 : vector<1x256xi32> to vector<1x256xf32>
    %cst_17 = arith.constant 4.000000e+00 : f32
    %66 = vector.broadcast %cst_17 : f32 to vector<1x256xf32>
    %67 = arith.cmpf oge, %0, %66 : vector<1x256xf32>
    %cst_18 = arith.constant 1.100000e+01 : f32
    %68 = vector.broadcast %cst_18 : f32 to vector<1x256xf32>
    %69 = arith.cmpf ole, %1, %68 : vector<1x256xf32>
    %70 = arith.andi %67, %69 : vector<1x256xi1>
    %71 = arith.extui %70 : vector<1x256xi1> to vector<1x256xi32>
    %72 = arith.sitofp %71 : vector<1x256xi32> to vector<1x256xf32>
    %cst_19 = arith.constant 3.000000e+00 : f32
    %73 = vector.broadcast %cst_19 : f32 to vector<1x256xf32>
    %74 = arith.cmpf oge, %0, %73 : vector<1x256xf32>
    %cst_20 = arith.constant 1.200000e+01 : f32
    %75 = vector.broadcast %cst_20 : f32 to vector<1x256xf32>
    %76 = arith.cmpf ole, %1, %75 : vector<1x256xf32>
    %77 = arith.andi %74, %76 : vector<1x256xi1>
    %78 = arith.extui %77 : vector<1x256xi1> to vector<1x256xi32>
    %79 = arith.sitofp %78 : vector<1x256xi32> to vector<1x256xf32>
    %cst_21 = arith.constant 2.000000e+00 : f32
    %80 = vector.broadcast %cst_21 : f32 to vector<1x256xf32>
    %81 = arith.cmpf oge, %0, %80 : vector<1x256xf32>
    %cst_22 = arith.constant 1.300000e+01 : f32
    %82 = vector.broadcast %cst_22 : f32 to vector<1x256xf32>
    %83 = arith.cmpf ole, %1, %82 : vector<1x256xf32>
    %84 = arith.andi %81, %83 : vector<1x256xi1>
    %85 = arith.extui %84 : vector<1x256xi1> to vector<1x256xi32>
    %86 = arith.sitofp %85 : vector<1x256xi32> to vector<1x256xf32>
    %cst_23 = arith.constant 1.000000e+00 : f32
    %87 = vector.broadcast %cst_23 : f32 to vector<1x256xf32>
    %88 = arith.cmpf oge, %0, %87 : vector<1x256xf32>
    %cst_24 = arith.constant 1.400000e+01 : f32
    %89 = vector.broadcast %cst_24 : f32 to vector<1x256xf32>
    %90 = arith.cmpf ole, %1, %89 : vector<1x256xf32>
    %91 = arith.andi %88, %90 : vector<1x256xi1>
    %92 = arith.extui %91 : vector<1x256xi1> to vector<1x256xi32>
    %93 = arith.sitofp %92 : vector<1x256xi32> to vector<1x256xf32>
    %cst_25 = arith.constant 1.400000e+01 : f32
    %94 = vector.broadcast %cst_25 : f32 to vector<1x256xf32>
    %95 = arith.cmpf ole, %0, %94 : vector<1x256xf32>
    %cst_26 = arith.constant 1.000000e+00 : f32
    %96 = vector.broadcast %cst_26 : f32 to vector<1x256xf32>
    %97 = arith.cmpf oge, %1, %96 : vector<1x256xf32>
    %98 = arith.andi %95, %97 : vector<1x256xi1>
    %99 = arith.extui %98 : vector<1x256xi1> to vector<1x256xi32>
    %100 = arith.sitofp %99 : vector<1x256xi32> to vector<1x256xf32>
    %cst_27 = arith.constant 1.300000e+01 : f32
    %101 = vector.broadcast %cst_27 : f32 to vector<1x256xf32>
    %102 = arith.cmpf ole, %0, %101 : vector<1x256xf32>
    %cst_28 = arith.constant 2.000000e+00 : f32
    %103 = vector.broadcast %cst_28 : f32 to vector<1x256xf32>
    %104 = arith.cmpf oge, %1, %103 : vector<1x256xf32>
    %105 = arith.andi %102, %104 : vector<1x256xi1>
    %106 = arith.extui %105 : vector<1x256xi1> to vector<1x256xi32>
    %107 = arith.sitofp %106 : vector<1x256xi32> to vector<1x256xf32>
    %cst_29 = arith.constant 1.200000e+01 : f32
    %108 = vector.broadcast %cst_29 : f32 to vector<1x256xf32>
    %109 = arith.cmpf ole, %0, %108 : vector<1x256xf32>
    %cst_30 = arith.constant 3.000000e+00 : f32
    %110 = vector.broadcast %cst_30 : f32 to vector<1x256xf32>
    %111 = arith.cmpf oge, %1, %110 : vector<1x256xf32>
    %112 = arith.andi %109, %111 : vector<1x256xi1>
    %113 = arith.extui %112 : vector<1x256xi1> to vector<1x256xi32>
    %114 = arith.sitofp %113 : vector<1x256xi32> to vector<1x256xf32>
    %cst_31 = arith.constant 1.100000e+01 : f32
    %115 = vector.broadcast %cst_31 : f32 to vector<1x256xf32>
    %116 = arith.cmpf ole, %0, %115 : vector<1x256xf32>
    %cst_32 = arith.constant 4.000000e+00 : f32
    %117 = vector.broadcast %cst_32 : f32 to vector<1x256xf32>
    %118 = arith.cmpf oge, %1, %117 : vector<1x256xf32>
    %119 = arith.andi %116, %118 : vector<1x256xi1>
    %120 = arith.extui %119 : vector<1x256xi1> to vector<1x256xi32>
    %121 = arith.sitofp %120 : vector<1x256xi32> to vector<1x256xf32>
    %c0_33 = arith.constant 0 : index
    %c0_34 = arith.constant 0 : index
    %122 = vector.load %arg3[%c0_33, %c0_34] : memref<8x32xf32, #tpu.memory_space<vmem>>, vector<8x32xf32>
    %c0_35 = arith.constant 0 : index
    %c0_36 = arith.constant 0 : index
    %123 = vector.load %arg5[%c0_35, %c0_36] : memref<4x72xf32, #tpu.memory_space<vmem>>, vector<4x72xf32>
    %c0_37 = arith.constant 0 : index
    %c0_38 = arith.constant 0 : index
    %124 = vector.load %arg6[%c0_37, %c0_38] : memref<4x72xf32, #tpu.memory_space<vmem>>, vector<4x72xf32>
    %c0_39 = arith.constant 0 : index
    %c0_40 = arith.constant 0 : index
    %125 = vector.load %arg7[%c0_39, %c0_40] : memref<8x72xf32, #tpu.memory_space<vmem>>, vector<8x72xf32>
    %c0_41 = arith.constant 0 : index
    %c0_42 = arith.constant 0 : index
    %126 = vector.load %arg9[%c0_41, %c0_42] : memref<16x16xf32, #tpu.memory_space<vmem>>, vector<16x16xf32>
    %c0_43 = arith.constant 0 : index
    %c0_44 = arith.constant 0 : index
    %127 = vector.load %arg4[%c0_43, %c0_44] : memref<8x1xf32, #tpu.memory_space<vmem>>, vector<8x1xf32>
    %c0_45 = arith.constant 0 : index
    %c0_46 = arith.constant 0 : index
    %128 = vector.load %arg8[%c0_45, %c0_46] : memref<16x1xf32, #tpu.memory_space<vmem>>, vector<16x1xf32>
    %c0_47 = arith.constant 0 : index
    %c0_48 = arith.constant 0 : index
    %129 = vector.load %arg10[%c0_47, %c0_48] : memref<16x1xf32, #tpu.memory_space<vmem>>, vector<16x1xf32>
    %c0_49 = arith.constant 0 : index
    %c0_50 = arith.constant 0 : index
    %c0_51 = arith.constant 0 : index
    %130 = vector.load %arg1[%c0_49, %c0_50, %c0_51] : memref<1x32x256xf32, #tpu.memory_space<vmem>>, vector<1x32x256xf32>
    %131 = vector.shape_cast %130 : vector<1x32x256xf32> to vector<32x256xf32>
    %cst_52 = arith.constant dense<0.000000e+00> : vector<8x256xf32>
    %132 = tpu.matmul %122, %131, %cst_52 {dimension_numbers = #tpu.dot_dimension_numbers<[1], [0], [0], [1], [0, 0, 1, 1], [], []>} : vector<8x32xf32>, vector<32x256xf32>, vector<8x256xf32> -> vector<8x256xf32>
    %133 = vector.broadcast %127 : vector<8x1xf32> to vector<8x256xf32>
    %134 = arith.addf %132, %133 : vector<8x256xf32>
    %cst_53 = arith.constant 0.000000e+00 : f32
    %135 = vector.broadcast %cst_53 : f32 to vector<8x256xf32>
    %136 = arith.maximumf %134, %135 : vector<8x256xf32>
    %137 = vector.extract_strided_slice %136 {offsets = [0, 252], sizes = [8, 4], strides = [1, 1]} : vector<8x256xf32> to vector<8x4xf32>
    %138 = vector.extract_strided_slice %136 {offsets = [0, 0], sizes = [8, 252], strides = [1, 1]} : vector<8x256xf32> to vector<8x252xf32>
    %139 = tpu.concatenate %137, %138 in 1 : vector<8x4xf32>, vector<8x252xf32> -> vector<8x256xf32>
    %140 = vector.broadcast %5 : vector<1x256xf32> to vector<8x256xf32>
    %141 = arith.mulf %139, %140 : vector<8x256xf32>
    %142 = vector.extract_strided_slice %136 {offsets = [0, 253], sizes = [8, 3], strides = [1, 1]} : vector<8x256xf32> to vector<8x3xf32>
    %143 = vector.extract_strided_slice %136 {offsets = [0, 0], sizes = [8, 253], strides = [1, 1]} : vector<8x256xf32> to vector<8x253xf32>
    %144 = tpu.concatenate %142, %143 in 1 : vector<8x3xf32>, vector<8x253xf32> -> vector<8x256xf32>
    %145 = vector.broadcast %9 : vector<1x256xf32> to vector<8x256xf32>
    %146 = arith.mulf %144, %145 : vector<8x256xf32>
    %147 = vector.extract_strided_slice %136 {offsets = [0, 254], sizes = [8, 2], strides = [1, 1]} : vector<8x256xf32> to vector<8x2xf32>
    %148 = vector.extract_strided_slice %136 {offsets = [0, 0], sizes = [8, 254], strides = [1, 1]} : vector<8x256xf32> to vector<8x254xf32>
    %149 = tpu.concatenate %147, %148 in 1 : vector<8x2xf32>, vector<8x254xf32> -> vector<8x256xf32>
    %150 = vector.broadcast %13 : vector<1x256xf32> to vector<8x256xf32>
    %151 = arith.mulf %149, %150 : vector<8x256xf32>
    %152 = vector.extract_strided_slice %136 {offsets = [0, 255], sizes = [8, 1], strides = [1, 1]} : vector<8x256xf32> to vector<8x1xf32>
    %153 = vector.extract_strided_slice %136 {offsets = [0, 0], sizes = [8, 255], strides = [1, 1]} : vector<8x256xf32> to vector<8x255xf32>
    %154 = tpu.concatenate %152, %153 in 1 : vector<8x1xf32>, vector<8x255xf32> -> vector<8x256xf32>
    %155 = vector.broadcast %17 : vector<1x256xf32> to vector<8x256xf32>
    %156 = arith.mulf %154, %155 : vector<8x256xf32>
    %157 = vector.extract_strided_slice %136 {offsets = [0, 1], sizes = [8, 255], strides = [1, 1]} : vector<8x256xf32> to vector<8x255xf32>
    %158 = vector.extract_strided_slice %136 {offsets = [0, 0], sizes = [8, 1], strides = [1, 1]} : vector<8x256xf32> to vector<8x1xf32>
    %159 = tpu.concatenate %157, %158 in 1 : vector<8x255xf32>, vector<8x1xf32> -> vector<8x256xf32>
    %160 = vector.broadcast %21 : vector<1x256xf32> to vector<8x256xf32>
    %161 = arith.mulf %159, %160 : vector<8x256xf32>
    %162 = vector.extract_strided_slice %136 {offsets = [0, 2], sizes = [8, 254], strides = [1, 1]} : vector<8x256xf32> to vector<8x254xf32>
    %163 = vector.extract_strided_slice %136 {offsets = [0, 0], sizes = [8, 2], strides = [1, 1]} : vector<8x256xf32> to vector<8x2xf32>
    %164 = tpu.concatenate %162, %163 in 1 : vector<8x254xf32>, vector<8x2xf32> -> vector<8x256xf32>
    %165 = vector.broadcast %25 : vector<1x256xf32> to vector<8x256xf32>
    %166 = arith.mulf %164, %165 : vector<8x256xf32>
    %167 = vector.extract_strided_slice %136 {offsets = [0, 3], sizes = [8, 253], strides = [1, 1]} : vector<8x256xf32> to vector<8x253xf32>
    %168 = vector.extract_strided_slice %136 {offsets = [0, 0], sizes = [8, 3], strides = [1, 1]} : vector<8x256xf32> to vector<8x3xf32>
    %169 = tpu.concatenate %167, %168 in 1 : vector<8x253xf32>, vector<8x3xf32> -> vector<8x256xf32>
    %170 = vector.broadcast %29 : vector<1x256xf32> to vector<8x256xf32>
    %171 = arith.mulf %169, %170 : vector<8x256xf32>
    %172 = vector.extract_strided_slice %136 {offsets = [0, 4], sizes = [8, 252], strides = [1, 1]} : vector<8x256xf32> to vector<8x252xf32>
    %173 = vector.extract_strided_slice %136 {offsets = [0, 0], sizes = [8, 4], strides = [1, 1]} : vector<8x256xf32> to vector<8x4xf32>
    %174 = tpu.concatenate %172, %173 in 1 : vector<8x252xf32>, vector<8x4xf32> -> vector<8x256xf32>
    %175 = vector.broadcast %33 : vector<1x256xf32> to vector<8x256xf32>
    %176 = arith.mulf %174, %175 : vector<8x256xf32>
    %177 = tpu.concatenate %141, %146, %151, %156, %136, %161, %166, %171, %176 in 0 : vector<8x256xf32>, vector<8x256xf32>, vector<8x256xf32>, vector<8x256xf32>, vector<8x256xf32>, vector<8x256xf32>, vector<8x256xf32>, vector<8x256xf32>, vector<8x256xf32> -> vector<72x256xf32>
    %cst_54 = arith.constant dense<0.000000e+00> : vector<4x256xf32>
    %178 = tpu.matmul %123, %177, %cst_54 {dimension_numbers = #tpu.dot_dimension_numbers<[1], [0], [0], [1], [0, 0, 1, 1], [], []>} : vector<4x72xf32>, vector<72x256xf32>, vector<4x256xf32> -> vector<4x256xf32>
    %179 = vector.extract_strided_slice %136 {offsets = [0, 192], sizes = [8, 64], strides = [1, 1]} : vector<8x256xf32> to vector<8x64xf32>
    %180 = vector.extract_strided_slice %136 {offsets = [0, 0], sizes = [8, 192], strides = [1, 1]} : vector<8x256xf32> to vector<8x192xf32>
    %181 = tpu.concatenate %179, %180 in 1 : vector<8x64xf32>, vector<8x192xf32> -> vector<8x256xf32>
    %182 = vector.broadcast %37 : vector<1x256xf32> to vector<8x256xf32>
    %183 = arith.mulf %181, %182 : vector<8x256xf32>
    %184 = vector.extract_strided_slice %136 {offsets = [0, 208], sizes = [8, 48], strides = [1, 1]} : vector<8x256xf32> to vector<8x48xf32>
    %185 = vector.extract_strided_slice %136 {offsets = [0, 0], sizes = [8, 208], strides = [1, 1]} : vector<8x256xf32> to vector<8x208xf32>
    %186 = tpu.concatenate %184, %185 in 1 : vector<8x48xf32>, vector<8x208xf32> -> vector<8x256xf32>
    %187 = vector.broadcast %41 : vector<1x256xf32> to vector<8x256xf32>
    %188 = arith.mulf %186, %187 : vector<8x256xf32>
    %189 = vector.extract_strided_slice %136 {offsets = [0, 224], sizes = [8, 32], strides = [1, 1]} : vector<8x256xf32> to vector<8x32xf32>
    %190 = vector.extract_strided_slice %136 {offsets = [0, 0], sizes = [8, 224], strides = [1, 1]} : vector<8x256xf32> to vector<8x224xf32>
    %191 = tpu.concatenate %189, %190 in 1 : vector<8x32xf32>, vector<8x224xf32> -> vector<8x256xf32>
    %192 = vector.broadcast %45 : vector<1x256xf32> to vector<8x256xf32>
    %193 = arith.mulf %191, %192 : vector<8x256xf32>
    %194 = vector.extract_strided_slice %136 {offsets = [0, 240], sizes = [8, 16], strides = [1, 1]} : vector<8x256xf32> to vector<8x16xf32>
    %195 = vector.extract_strided_slice %136 {offsets = [0, 0], sizes = [8, 240], strides = [1, 1]} : vector<8x256xf32> to vector<8x240xf32>
    %196 = tpu.concatenate %194, %195 in 1 : vector<8x16xf32>, vector<8x240xf32> -> vector<8x256xf32>
    %197 = vector.broadcast %49 : vector<1x256xf32> to vector<8x256xf32>
    %198 = arith.mulf %196, %197 : vector<8x256xf32>
    %199 = vector.extract_strided_slice %136 {offsets = [0, 16], sizes = [8, 240], strides = [1, 1]} : vector<8x256xf32> to vector<8x240xf32>
    %200 = vector.extract_strided_slice %136 {offsets = [0, 0], sizes = [8, 16], strides = [1, 1]} : vector<8x256xf32> to vector<8x16xf32>
    %201 = tpu.concatenate %199, %200 in 1 : vector<8x240xf32>, vector<8x16xf32> -> vector<8x256xf32>
    %202 = vector.broadcast %53 : vector<1x256xf32> to vector<8x256xf32>
    %203 = arith.mulf %201, %202 : vector<8x256xf32>
    %204 = vector.extract_strided_slice %136 {offsets = [0, 32], sizes = [8, 224], strides = [1, 1]} : vector<8x256xf32> to vector<8x224xf32>
    %205 = vector.extract_strided_slice %136 {offsets = [0, 0], sizes = [8, 32], strides = [1, 1]} : vector<8x256xf32> to vector<8x32xf32>
    %206 = tpu.concatenate %204, %205 in 1 : vector<8x224xf32>, vector<8x32xf32> -> vector<8x256xf32>
    %207 = vector.broadcast %57 : vector<1x256xf32> to vector<8x256xf32>
    %208 = arith.mulf %206, %207 : vector<8x256xf32>
    %209 = vector.extract_strided_slice %136 {offsets = [0, 48], sizes = [8, 208], strides = [1, 1]} : vector<8x256xf32> to vector<8x208xf32>
    %210 = vector.extract_strided_slice %136 {offsets = [0, 0], sizes = [8, 48], strides = [1, 1]} : vector<8x256xf32> to vector<8x48xf32>
    %211 = tpu.concatenate %209, %210 in 1 : vector<8x208xf32>, vector<8x48xf32> -> vector<8x256xf32>
    %212 = vector.broadcast %61 : vector<1x256xf32> to vector<8x256xf32>
    %213 = arith.mulf %211, %212 : vector<8x256xf32>
    %214 = vector.extract_strided_slice %136 {offsets = [0, 64], sizes = [8, 192], strides = [1, 1]} : vector<8x256xf32> to vector<8x192xf32>
    %215 = vector.extract_strided_slice %136 {offsets = [0, 0], sizes = [8, 64], strides = [1, 1]} : vector<8x256xf32> to vector<8x64xf32>
    %216 = tpu.concatenate %214, %215 in 1 : vector<8x192xf32>, vector<8x64xf32> -> vector<8x256xf32>
    %217 = vector.broadcast %65 : vector<1x256xf32> to vector<8x256xf32>
    %218 = arith.mulf %216, %217 : vector<8x256xf32>
    %219 = tpu.concatenate %183, %188, %193, %198, %136, %203, %208, %213, %218 in 0 : vector<8x256xf32>, vector<8x256xf32>, vector<8x256xf32>, vector<8x256xf32>, vector<8x256xf32>, vector<8x256xf32>, vector<8x256xf32>, vector<8x256xf32>, vector<8x256xf32> -> vector<72x256xf32>
    %cst_55 = arith.constant dense<0.000000e+00> : vector<4x256xf32>
    %220 = tpu.matmul %124, %219, %cst_55 {dimension_numbers = #tpu.dot_dimension_numbers<[1], [0], [0], [1], [0, 0, 1, 1], [], []>} : vector<4x72xf32>, vector<72x256xf32>, vector<4x256xf32> -> vector<4x256xf32>
    %221 = vector.extract_strided_slice %136 {offsets = [0, 196], sizes = [8, 60], strides = [1, 1]} : vector<8x256xf32> to vector<8x60xf32>
    %222 = vector.extract_strided_slice %136 {offsets = [0, 0], sizes = [8, 196], strides = [1, 1]} : vector<8x256xf32> to vector<8x196xf32>
    %223 = tpu.concatenate %221, %222 in 1 : vector<8x60xf32>, vector<8x196xf32> -> vector<8x256xf32>
    %224 = vector.broadcast %72 : vector<1x256xf32> to vector<8x256xf32>
    %225 = arith.mulf %223, %224 : vector<8x256xf32>
    %226 = vector.extract_strided_slice %136 {offsets = [0, 211], sizes = [8, 45], strides = [1, 1]} : vector<8x256xf32> to vector<8x45xf32>
    %227 = vector.extract_strided_slice %136 {offsets = [0, 0], sizes = [8, 211], strides = [1, 1]} : vector<8x256xf32> to vector<8x211xf32>
    %228 = tpu.concatenate %226, %227 in 1 : vector<8x45xf32>, vector<8x211xf32> -> vector<8x256xf32>
    %229 = vector.broadcast %79 : vector<1x256xf32> to vector<8x256xf32>
    %230 = arith.mulf %228, %229 : vector<8x256xf32>
    %231 = vector.extract_strided_slice %136 {offsets = [0, 226], sizes = [8, 30], strides = [1, 1]} : vector<8x256xf32> to vector<8x30xf32>
    %232 = vector.extract_strided_slice %136 {offsets = [0, 0], sizes = [8, 226], strides = [1, 1]} : vector<8x256xf32> to vector<8x226xf32>
    %233 = tpu.concatenate %231, %232 in 1 : vector<8x30xf32>, vector<8x226xf32> -> vector<8x256xf32>
    %234 = vector.broadcast %86 : vector<1x256xf32> to vector<8x256xf32>
    %235 = arith.mulf %233, %234 : vector<8x256xf32>
    %236 = vector.extract_strided_slice %136 {offsets = [0, 241], sizes = [8, 15], strides = [1, 1]} : vector<8x256xf32> to vector<8x15xf32>
    %237 = vector.extract_strided_slice %136 {offsets = [0, 0], sizes = [8, 241], strides = [1, 1]} : vector<8x256xf32> to vector<8x241xf32>
    %238 = tpu.concatenate %236, %237 in 1 : vector<8x15xf32>, vector<8x241xf32> -> vector<8x256xf32>
    %239 = vector.broadcast %93 : vector<1x256xf32> to vector<8x256xf32>
    %240 = arith.mulf %238, %239 : vector<8x256xf32>
    %241 = vector.extract_strided_slice %136 {offsets = [0, 15], sizes = [8, 241], strides = [1, 1]} : vector<8x256xf32> to vector<8x241xf32>
    %242 = vector.extract_strided_slice %136 {offsets = [0, 0], sizes = [8, 15], strides = [1, 1]} : vector<8x256xf32> to vector<8x15xf32>
    %243 = tpu.concatenate %241, %242 in 1 : vector<8x241xf32>, vector<8x15xf32> -> vector<8x256xf32>
    %244 = vector.broadcast %100 : vector<1x256xf32> to vector<8x256xf32>
    %245 = arith.mulf %243, %244 : vector<8x256xf32>
    %246 = vector.extract_strided_slice %136 {offsets = [0, 30], sizes = [8, 226], strides = [1, 1]} : vector<8x256xf32> to vector<8x226xf32>
    %247 = vector.extract_strided_slice %136 {offsets = [0, 0], sizes = [8, 30], strides = [1, 1]} : vector<8x256xf32> to vector<8x30xf32>
    %248 = tpu.concatenate %246, %247 in 1 : vector<8x226xf32>, vector<8x30xf32> -> vector<8x256xf32>
    %249 = vector.broadcast %107 : vector<1x256xf32> to vector<8x256xf32>
    %250 = arith.mulf %248, %249 : vector<8x256xf32>
    %251 = vector.extract_strided_slice %136 {offsets = [0, 45], sizes = [8, 211], strides = [1, 1]} : vector<8x256xf32> to vector<8x211xf32>
    %252 = vector.extract_strided_slice %136 {offsets = [0, 0], sizes = [8, 45], strides = [1, 1]} : vector<8x256xf32> to vector<8x45xf32>
    %253 = tpu.concatenate %251, %252 in 1 : vector<8x211xf32>, vector<8x45xf32> -> vector<8x256xf32>
    %254 = vector.broadcast %114 : vector<1x256xf32> to vector<8x256xf32>
    %255 = arith.mulf %253, %254 : vector<8x256xf32>
    %256 = vector.extract_strided_slice %136 {offsets = [0, 60], sizes = [8, 196], strides = [1, 1]} : vector<8x256xf32> to vector<8x196xf32>
    %257 = vector.extract_strided_slice %136 {offsets = [0, 0], sizes = [8, 60], strides = [1, 1]} : vector<8x256xf32> to vector<8x60xf32>
    %258 = tpu.concatenate %256, %257 in 1 : vector<8x196xf32>, vector<8x60xf32> -> vector<8x256xf32>
    %259 = vector.broadcast %121 : vector<1x256xf32> to vector<8x256xf32>
    %260 = arith.mulf %258, %259 : vector<8x256xf32>
    %261 = tpu.concatenate %225, %230, %235, %240, %136, %245, %250, %255, %260 in 0 : vector<8x256xf32>, vector<8x256xf32>, vector<8x256xf32>, vector<8x256xf32>, vector<8x256xf32>, vector<8x256xf32>, vector<8x256xf32>, vector<8x256xf32>, vector<8x256xf32> -> vector<72x256xf32>
    %cst_56 = arith.constant dense<0.000000e+00> : vector<8x256xf32>
    %262 = tpu.matmul %125, %261, %cst_56 {dimension_numbers = #tpu.dot_dimension_numbers<[1], [0], [0], [1], [0, 0, 1, 1], [], []>} : vector<8x72xf32>, vector<72x256xf32>, vector<8x256xf32> -> vector<8x256xf32>
    %263 = tpu.concatenate %178, %220, %262 in 0 : vector<4x256xf32>, vector<4x256xf32>, vector<8x256xf32> -> vector<16x256xf32>
    %264 = vector.broadcast %128 : vector<16x1xf32> to vector<16x256xf32>
    %265 = arith.addf %263, %264 : vector<16x256xf32>
    %cst_57 = arith.constant 0.000000e+00 : f32
    %266 = vector.broadcast %cst_57 : f32 to vector<16x256xf32>
    %267 = arith.maximumf %265, %266 : vector<16x256xf32>
    %cst_58 = arith.constant dense<0.000000e+00> : vector<16x256xf32>
    %268 = tpu.matmul %126, %267, %cst_58 {dimension_numbers = #tpu.dot_dimension_numbers<[1], [0], [0], [1], [0, 0, 1, 1], [], []>} : vector<16x16xf32>, vector<16x256xf32>, vector<16x256xf32> -> vector<16x256xf32>
    %269 = vector.broadcast %129 : vector<16x1xf32> to vector<16x256xf32>
    %270 = arith.addf %268, %269 : vector<16x256xf32>
    %cst_59 = arith.constant 0.000000e+00 : f32
    %271 = vector.broadcast %cst_59 : f32 to vector<16x256xf32>
    %272 = arith.maximumf %270, %271 : vector<16x256xf32>
    %c0_60 = arith.constant 0 : index
    %c0_61 = arith.constant 0 : index
    %c0_62 = arith.constant 0 : index
    %273 = vector.load %arg11[%c0_60, %c0_61, %c0_62] : memref<1x16x256xf32, #tpu.memory_space<vmem>>, vector<1x16x256xf32>
    %274 = vector.shape_cast %273 : vector<1x16x256xf32> to vector<16x256xf32>
    %275 = vector.shape_cast %272 : vector<16x256xf32> to vector<1x16x256xf32>
    tpu.vector_store %arg11[%c0_60, %c0_61, %c0_62], %275 {strides = array<i32>} : memref<1x16x256xf32, #tpu.memory_space<vmem>>, vector<1x16x256xf32>,
    return
  }
  func.func @transform_0(%arg0: i32) -> (i32, i32, i32) {
    %c0_i32 = arith.constant 0 : i32
    %c0_i32_0 = arith.constant 0 : i32
    %c0_i32_1 = arith.constant 0 : i32
    return %arg0, %c0_i32, %c0_i32_0 : i32, i32, i32
  }
  func.func @transform_1(%arg0: i32) -> (i32, i32) {
    %c0_i32 = arith.constant 0 : i32
    %c0_i32_0 = arith.constant 0 : i32
    %c0_i32_1 = arith.constant 0 : i32
    return %c0_i32, %c0_i32_0 : i32, i32
  }
  func.func @transform_2(%arg0: i32) -> (i32, i32) {
    %c0_i32 = arith.constant 0 : i32
    %c0_i32_0 = arith.constant 0 : i32
    %c0_i32_1 = arith.constant 0 : i32
    return %c0_i32, %c0_i32_0 : i32, i32
  }
  func.func @transform_3(%arg0: i32) -> (i32, i32) {
    %c0_i32 = arith.constant 0 : i32
    %c0_i32_0 = arith.constant 0 : i32
    %c0_i32_1 = arith.constant 0 : i32
    return %c0_i32, %c0_i32_0 : i32, i32
  }
  func.func @transform_4(%arg0: i32) -> (i32, i32) {
    %c0_i32 = arith.constant 0 : i32
    %c0_i32_0 = arith.constant 0 : i32
    %c0_i32_1 = arith.constant 0 : i32
    return %c0_i32, %c0_i32_0 : i32, i32
  }
  func.func @transform_5(%arg0: i32) -> (i32, i32) {
    %c0_i32 = arith.constant 0 : i32
    %c0_i32_0 = arith.constant 0 : i32
    %c0_i32_1 = arith.constant 0 : i32
    return %c0_i32, %c0_i32_0 : i32, i32
  }
  func.func @transform_6(%arg0: i32) -> (i32, i32) {
    %c0_i32 = arith.constant 0 : i32
    %c0_i32_0 = arith.constant 0 : i32
    %c0_i32_1 = arith.constant 0 : i32
    return %c0_i32, %c0_i32_0 : i32, i32
  }
  func.func @transform_7(%arg0: i32) -> (i32, i32) {
    %c0_i32 = arith.constant 0 : i32
    %c0_i32_0 = arith.constant 0 : i32
    %c0_i32_1 = arith.constant 0 : i32
    return %c0_i32, %c0_i32_0 : i32, i32
  }
  func.func @transform_8(%arg0: i32) -> (i32, i32) {
    %c0_i32 = arith.constant 0 : i32
    %c0_i32_0 = arith.constant 0 : i32
    %c0_i32_1 = arith.constant 0 : i32
    return %c0_i32, %c0_i32_0 : i32, i32
  }
  func.func @transform_9(%arg0: i32) -> (i32, i32) {
    %c0_i32 = arith.constant 0 : i32
    %c0_i32_0 = arith.constant 0 : i32
    %c0_i32_1 = arith.constant 0 : i32
    return %c0_i32, %c0_i32_0 : i32, i32
  }
  func.func @transform_10(%arg0: i32) -> (i32, i32, i32) {
    %c0_i32 = arith.constant 0 : i32
    %c0_i32_0 = arith.constant 0 : i32
    %c0_i32_1 = arith.constant 0 : i32
    return %arg0, %c0_i32, %c0_i32_0 : i32, i32, i32
  }
}

</mosaic_0001>

<bundles_post_ra>
// kernel: tpu_custom_call.1
= control target key start
LH: loop header
LB: loop body
LE: loop exit
PB: predicated region body
PF: predicated region fallthrough
CT: control target
= control target key end

     0   :  { %6 = vsyncpa [#allocation3], 0  ;;  %s127_s0 = inlined_call_operand.hbm [shape: f32[8,256], index: 0, kind: input, shape index: {}]   ;;  %s128_s1 = inlined_call_operand.hbm [shape: f32[8,256], index: 1, kind: output, shape index: {}]  }
   0x1   :  { %7 = vsyncpa [#allocation4], 0  ;;  %s13_s8 = sshll.u32 %s127_s0, 4  ;;  %s108_s9 = smov [#allocation2]   ;;  %s14_s8 = int_to_ptr.hbm [resolvable:$true] %s13_s8 }
   0x2   :  { %s15_s10 = sshll.u32 %s108_s9, 4  ;;  %s16_s10 = int_to_ptr.vmem [resolvable:$true] %s15_s10 }
   0x3   :  { %18 = dma.hbm_to_vmem [thread:$0]  %s14_s8, 256, %s16_s10, [#allocation3]  }
   0x4   :  { %104 = dma.done.wait [#allocation3], 256  }
   0x5   :  { %105 = vsyncadd [#allocation3], 4294967040  ;;  %v23_v0 = vld [vmem:[#allocation2] sm:$0xff]  ;;  %s109_s11 = smov 5   ;;  %v24_v1 = vld [vmem:[#allocation2 + $0x8] sm:$0xff]  ;;  %v29_v2 = vlaneseq  ;;  %s110_s12 = smov [#allocation5]  }
   0x6   :  { %25 = vrot.lane.b32.xlu0 %v23_v0, %s109_s11  ;;  %s41_s13 = sshll.u32 %s110_s12, 4  ;;  %s43_s15 = sshll.u32 %s128_s1, 4  ;;  %s42_s13 = int_to_ptr.vmem [resolvable:$true] %s41_s13  ;;  %s44_s15 = int_to_ptr.hbm [resolvable:$true] %s43_s15 }
   0x7   :  { %v30_v4 = vand.u32 127, %v29_v2 }
   0x9   :  { %vm31_vm0 = vcmp.lt.s32.totalorder %v30_v4, 5 }
   0xe   :  { %27 = vrot.lane.b32.xlu0 %v24_v1, %s109_s11 }
  0x78   :  { %v26_v3 = vpop.permute.xlu0 %25 }
  0x80   :  { %v28_v5 = vpop.permute.xlu0 %27 }
  0x81   :  { %v32_v6 = vsel %vm31_vm0, %v26_v3, %v28_v5  ;;  %v33_v7 = vsel %vm31_vm0, %v28_v5, %v26_v3 }
  0x82   :  { %34 = vst [vmem:[#allocation5] sm:$0xff] %v33_v7 }
  0x83   :  { %35 = vst [vmem:[#allocation5 + $0x8] sm:$0xff] %v32_v6 }
  0x84   :  { %46 = dma.vmem_to_hbm [thread:$0]  %s42_s13, 256, %s44_s15, [#allocation4]  }
  0x85   :  { %106 = dma.done.wait [#allocation4], 256  }
  0x86   :  { %107 = vsyncadd [#allocation4], 4294967040 }
  0x87   :  { %51 = vsyncpa [#allocation3], 1 }
  0x88   :  { %52 = vsyncpa [#allocation4], 1 }

// kernel: decoder_block_pallas.1
= control target key start
LH: loop header
LB: loop body
LE: loop exit
PB: predicated region body
PF: predicated region fallthrough
CT: control target
= control target key end

     0   :  { %s1360_s13 = smov 0   ;;  %s1658_s0 = inlined_call_operand.vmem [shape: f32[2,32,256], index: 0, kind: input, shape index: {}]   ;;  %s1659_s1 = inlined_call_operand.vmem [shape: f32[2,256], index: 1, kind: input, shape index: {}]   ;;  %s1660_s2 = inlined_call_operand.vmem [shape: f32[8,32], index: 2, kind: input, shape index: {}]   ;;  %s1661_s3 = inlined_call_operand.vmem [shape: f32[8,1], index: 3, kind: input, shape index: {}]   ;;  %s1662_s4 = inlined_call_operand.vmem [shape: f32[4,72], index: 4, kind: input, shape index: {}]   ;;  %s1663_s5 = inlined_call_operand.vmem [shape: f32[4,72], index: 5, kind: input, shape index: {}]   ;;  %s1664_s6 = inlined_call_operand.vmem [shape: f32[8,72], index: 6, kind: input, shape index: {}]   ;;  %s1665_s7 = inlined_call_operand.vmem [shape: f32[16,1], index: 7, kind: input, shape index: {}]   ;;  %s1666_s8 = inlined_call_operand.vmem [shape: f32[16,16], index: 8, kind: input, shape index: {}]   ;;  %s1667_s9 = inlined_call_operand.vmem [shape: f32[16,1], index: 9, kind: input, shape index: {}]   ;;  %s1668_s10 = inlined_call_operand.vmem [shape: f32[2,16,256], index: 10, kind: output, shape index: {}]  }
   0x1 LB: > { %s1186_s14 = sadd.s32 4294967295, %s1278_s13   ;;  %p1190_p0 = scmp.ge.s32.totalorder %s1278_s13, 1  ;;  %s1278_s13 = sphi %s1360_s13, %s20_s13  }
   0x2   : > { %p312_p1 = scmp.lt.s32.totalorder %s1278_s13, 3 }
   0x4   : > { %p313_p2 = pnand %p1190_p0, %p312_p1 }
   0x5   : > { %p350_p3 = scmp.lt.s32.totalorder (!%p313_p2), %s1186_s14, 1  ;;  %s1281_s23 = smov (!%p313_p2), 125  }
   0x6   : > { %316 = sbr.rel (%p313_p2) target bundleno = 667 (0x29b), region = 60  ;;  %s1282_s24 = smov (!%p313_p2), 124  }
   0x7   : > { %s1283_s25 = smov (!%p313_p2), 126   ;;  %s1284_s26 = smov (!%p313_p2), 127  }
   0x8   : > { %s1285_s27 = smov (!%p313_p2), 68   ;;  %s1286_s28 = smov (!%p313_p2), 1  }
   0x9   : > { %s1287_s29 = smov (!%p313_p2), 83   ;;  %s1288_s30 = smov (!%p313_p2), 2  }
   0xa   : > { %s1289_s11 = smov (!%p313_p2), 98   ;;  %s1290_s12 = smov (!%p313_p2), 64  }
   0xb   : > { %v441_v0 = vld [vmem:[%s1661_s3] sm:$0xff]  ;;  %v1280_v1 = vmov 0   ;;  %s1672_s14 = smov (!%p350_p3, %s1186_s14), 1  ;;  %vm459_vm0 = vcmask 261120   ;;  %s1291_s15 = smov 3   ;;  %v1302_v22 = vmov 0.0  }
   0xc   : > { %1269 = vset.pattern.permute.xlu0 %v1280_v1  ;;  %1270 = vset.pattern.permute.xlu2 %v1280_v1  ;;  %s1234_s17 = sshll.u32 %s1672_s14, 6  ;;  %v435_v10 = vld [vmem:[%s1660_s2] sm:$0xff]  ;;  %s1292_s16 = smov 113   ;;  %vm630_vm2 = vcmask 1014784   ;;  %vm613_vm5 = vcmask 1022976   ;;  %vm596_vm6 = vcmask 1031168  }
   0xd   : > { %456 = vperm.xlu0 %1269, %v441_v0   ;;  %1271 = vset.pattern.permute.xlu1 %v1280_v1  ;;  %s354_s20 = scalar_lea.vmem %s1658_s0, %s1234_s17  ;;  %s1293_s17 = smov 80   ;;  %v1430_v20 = vld [vmem:[%s1659_s1 + $0x1] ss:$2 sm:$0x3]  ;;  %vm579_vm8 = vcmask 1039360   ;;  %vm563_vm10 = vcmask 7168  }
   0xe   : > { %v452_v2 = vld [vmem:[%s354_s20 + $0x30] sm:$0xff]  ;;  %v453_v3 = vld [vmem:[%s354_s20 + $0x38] sm:$0xff]  ;;  %v450_v4 = vld [vmem:[%s354_s20 + $0x20] sm:$0xff]  ;;  %s1294_s18 = smov 4   ;;  %s1295_s19 = smov 96   ;;  %vm384_vm1 = vcmp.le.f32.partialorder %v1430_v20, 11.0 }
   0xf   : > { %475 = vmatpush.msra.mxu0 %v452_v2  ;;  %495 = vmatpush.msra.mxu1 %v453_v3  ;;  %v451_v5 = vld [vmem:[%s354_s20 + $0x28] sm:$0xff]  ;;  %v448_v6 = vld [vmem:[%s354_s20 + $0x10] sm:$0xff]  ;;  %v449_v7 = vld [vmem:[%s354_s20 + $0x18] sm:$0xff]  ;;  %s1297_s21 = smov 112   ;;  %s1298_s22 = smov 30   ;;  %v1203_v23 = vsel %vm384_vm1, 1.0, %v1302_v22 }
  0x10   : > { %v446_v8 = vld [vmem:[%s354_s20] sm:$0xff]  ;;  %v447_v9 = vld [vmem:[%s354_s20 + $0x8] sm:$0xff]  ;;  %s1296_s20 = smov 15   ;;  %v637_v24 = vperm.slane %v1203_v23, 0  ;;  %v638_v25 = vperm.slane %v1203_v23, 1  ;;  %vm381_vm3 = vcmp.le.f32.partialorder %v1430_v20, 12.0 }
  0x11   : > { %476 = vmatpush.msra.mxu0 %v450_v4  ;;  %496 = vmatpush.msra.mxu1 %v451_v5  ;;  %vm378_vm4 = vcmp.le.f32.partialorder %v1430_v20, 13.0  ;;  %v1202_v33 = vsel %vm381_vm3, 1.0, %v1302_v22  ;;  %v442_v34 = vld [vmem:[%s1665_s7] sm:$0xff]  ;;  %vm375_vm7 = vcmp.le.f32.partialorder %v1430_v20, 14.0  ;;  %vm372_vm9 = vcmp.ge.f32.partialorder %v1430_v20, 1.0 }
  0x12   : > { %v1201_v35 = vsel %vm378_vm4, 1.0, %v1302_v22  ;;  %v620_v36 = vperm.slane %v1202_v33, 0  ;;  %v621_v37 = vperm.slane %v1202_v33, 1  ;;  %v1200_v48 = vsel %vm375_vm7, 1.0, %v1302_v22 }
  0x13   : > { %477 = vmatpush.msra.mxu0 %v448_v6  ;;  %497 = vmatpush.msra.mxu1 %v449_v7  ;;  %v603_v39 = vperm.slane %v1201_v35, 0  ;;  %v604_v40 = vperm.slane %v1201_v35, 1  ;;  %v586_v52 = vperm.slane %v1200_v48, 0  ;;  %v587_v53 = vperm.slane %v1200_v48, 1 }
  0x14   : > { %v1199_v60 = vsel %vm372_vm9, 1.0, %v1302_v22  ;;  %vm369_vm11 = vcmp.ge.f32.partialorder %v1430_v20, 2.0  ;;  %vm546_vm12 = vcmask 15360   ;;  %vm692_vm14 = vcmask 523264  }
  0x15   : > { %478 = vmatpush.msra.mxu0 %v446_v8  ;;  %498 = vmatpush.msra.mxu1 %v447_v9  ;;  %v569_v62 = vperm.slane %v1199_v60, 0  ;;  %v570_v63 = vperm.slane %v1199_v60, 1  ;;  %v1198_v9 = vsel %vm369_vm11, 1.0, %v1302_v22  ;;  %vm366_vm15 = vcmp.ge.f32.partialorder %v1430_v20, 3.0 }
  0x16   : > { %1220 = vmatmul.msk.f32.vlgmr.msra.gmra.mxu0 %vm459_vm0, %v435_v10  ;;  %1221 = vmatmul.msk.f32.vlgmr.msra.gmra.mxu1 %vm459_vm0, %v435_v10  ;;  %v552_v10 = vperm.slane %v1198_v9, 0  ;;  %v1197_v33 = vsel %vm366_vm15, 1.0, %v1302_v22 }
  0x17   : > { %v535_v35 = vperm.slane %v1197_v33, 0 }
  0x7f   : > { %v457_v11 = vpop.permute.xlu0 %456 }
  0x93   : > { %v480_v12 = vpop.f32.mrf.mxu0  ;;  %v500_v13 = vpop.f32.mrf.mxu1 }
  0x94   : > { %v481_v14 = vadd.f32 %v480_v12, %v457_v11  ;;  %v501_v15 = vadd.f32 %v500_v13, %v457_v11  ;;  %v553_v11 = vperm.slane %v1198_v9, 1  ;;  %v1479_v12 = vld [vmem:[%s1659_s1] ss:$2 sm:$0x3] }
  0x95   : > { %vm408_vm13 = vcmp.le.f32.partialorder %v1479_v12, 11.0 }
  0x96   : > { %v1382_v16 = vmax.f32 %v481_v14, 0.0  ;;  %v1384_v17 = vmax.f32 %v501_v15, 0.0 }
  0x98   : > { %611 = vrot.lane.b32.xlu2 %v1384_v17, %s1281_s23  ;;  %628 = vrot.lane.b32.xlu1 %v1384_v17, %s1282_s24 }
  0x99   : > { %626 = vrot.lane.b32.xlu0 %v1382_v16, %s1282_s24  ;;  %s1300_s24 = smov 16  }
  0xa0   : > { %592 = vrot.lane.b32.xlu2 %v1382_v16, %s1283_s25  ;;  %609 = vrot.lane.b32.xlu1 %v1382_v16, %s1281_s23  ;;  %s1299_s23 = smov 45  }
  0xa1   : > { %594 = vrot.lane.b32.xlu0 %v1384_v17, %s1283_s25  ;;  %s1301_s25 = smov 60  }
  0xa8   : > { %577 = vrot.lane.b32.xlu2 %v1384_v17, %s1284_s26  ;;  %575 = vrot.lane.b32.xlu1 %v1382_v16, %s1284_s26 }
  0xa9   : > { %974 = vrot.lane.b32.xlu0 %v1382_v16, %s1285_s27 }
  0xb0   : > { %558 = vrot.lane.b32.xlu2 %v1384_v17, %s1286_s28  ;;  %976 = vrot.lane.b32.xlu1 %v1384_v17, %s1285_s27 }
  0xb1   : > { %561 = vrot.lane.b32.xlu0 %v1382_v16, %s1286_s28  ;;  %s1303_s28 = smov 32  }
  0xb8   : > { %959 = vrot.lane.b32.xlu2 %v1384_v17, %s1287_s29  ;;  %957 = vrot.lane.b32.xlu1 %v1382_v16, %s1287_s29  ;;  %s1304_s29 = smov 48  }
  0xb9   : > { %541 = vrot.lane.b32.xlu0 %v1384_v17, %s1288_s30 }
  0xc0   : > { %940 = vrot.lane.b32.xlu2 %v1382_v16, %s1289_s11  ;;  %544 = vrot.lane.b32.xlu1 %v1382_v16, %s1288_s30 }
  0xc1   : > { %942 = vrot.lane.b32.xlu0 %v1384_v17, %s1289_s11 }
  0xc8   : > { %690 = vrot.lane.b32.xlu2 %v1382_v16, %s1290_s12  ;;  %687 = vrot.lane.b32.xlu1 %v1384_v17, %s1290_s12  ;;  %s1235_s12 = sshll.u32 %s1672_s14, 5 }
  0xc9   : > { %524 = vrot.lane.b32.xlu0 %v1384_v17, %s1291_s15 }
  0xd0   : > { %923 = vrot.lane.b32.xlu2 %v1382_v16, %s1292_s16  ;;  %527 = vrot.lane.b32.xlu1 %v1382_v16, %s1291_s15 }
  0xd1   : > { %925 = vrot.lane.b32.xlu0 %v1384_v17, %s1292_s16 }
  0xd8   : > { %790 = vrot.lane.b32.xlu2 %v1384_v17, %s1293_s17  ;;  %788 = vrot.lane.b32.xlu1 %v1382_v16, %s1293_s17  ;;  %s359_s17 = scalar_lea.vmem %s1668_s10, %s1235_s12 }
  0xd9   : > { %506 = vrot.lane.b32.xlu0 %v1384_v17, %s1294_s18 }
  0xe0   : > { %771 = vrot.lane.b32.xlu2 %v1382_v16, %s1295_s19  ;;  %510 = vrot.lane.b32.xlu1 %v1382_v16, %s1294_s18 }
  0xe1   : > { %773 = vrot.lane.b32.xlu0 %v1384_v17, %s1295_s19 }
  0xe8   : > { %909 = vrot.lane.b32.xlu2 %v1382_v16, %s1296_s20  ;;  %906 = vrot.lane.b32.xlu1 %v1384_v17, %s1296_s20 }
  0xe9   : > { %754 = vrot.lane.b32.xlu0 %v1382_v16, %s1297_s21 }
  0xf0   : > { %889 = vrot.lane.b32.xlu2 %v1384_v17, %s1298_s22  ;;  %756 = vrot.lane.b32.xlu1 %v1384_v17, %s1297_s21 }
  0xf1   : > { %892 = vrot.lane.b32.xlu0 %v1382_v16, %s1298_s22 }
  0xf2   : > { %v612_v18 = vpop.permute.xlu2 %611 }
  0xf8   : > { %875 = vrot.lane.b32.xlu2 %v1382_v16, %s1299_s23  ;;  %872 = vrot.lane.b32.xlu1 %v1384_v17, %s1299_s23 }
  0xf9   : > { %737 = vrot.lane.b32.xlu0 %v1384_v17, %s1300_s24 }
  0xfa   : > { %v593_v19 = vpop.permute.xlu2 %592 }
 0x100   : > { %855 = vrot.lane.b32.xlu2 %v1384_v17, %s1301_s25  ;;  %740 = vrot.lane.b32.xlu1 %v1382_v16, %s1300_s24 }
 0x101   : > { %858 = vrot.lane.b32.xlu0 %v1382_v16, %s1301_s25 }
 0x102   : > { %v578_v21 = vpop.permute.xlu2 %577 }
 0x108   : > { %724 = vrot.lane.b32.xlu2 %v1382_v16, %s1303_s28  ;;  %721 = vrot.lane.b32.xlu1 %v1384_v17, %s1303_s28 }
 0x109   : > { %704 = vrot.lane.b32.xlu0 %v1384_v17, %s1304_s29 }
 0x10a   : > { %v629_v26 = vpop.permute.xlu1 %628  ;;  %v559_v28 = vpop.permute.xlu2 %558 }
 0x10b   : > { %v627_v27 = vpop.permute.xlu0 %626 }
 0x10c   : > { %v631_v29 = vsel %vm630_vm2, %v627_v27, %v629_v26  ;;  %v635_v30 = vsel %vm630_vm2, %v629_v26, %v627_v27  ;;  %vm529_vm2 = vcmask 23552  }
 0x10d   : > { %v641_v31 = vmul.f32 %v637_v24, %v631_v29  ;;  %v642_v32 = vmul.f32 %v638_v25, %v635_v30  ;;  %v1211_v24 = vsel %vm408_vm13, 1.0, %v1302_v22 }
 0x10e   : > { %v806_v25 = vperm.slane %v1211_v24, 0  ;;  %v807_v26 = vperm.slane %v1211_v24, 1 }
 0x10f   : > { %654 = vmatpush.msra.mxu2 %v641_v31  ;;  %674 = vmatpush.msra.mxu3 %v642_v32 }
 0x110   : > { %707 = vrot.lane.b32.xlu1 %v1382_v16, %s1304_s29 }
 0x111   : > { %1045 = vperm.xlu0 %1269, %v442_v34  }
 0x112   : > { %v610_v38 = vpop.permute.xlu1 %609  ;;  %v1456_v49 = vpop.permute.xlu2 %959 }
 0x113   : > { %v614_v41 = vsel %vm613_vm5, %v610_v38, %v612_v18  ;;  %v618_v42 = vsel %vm613_vm5, %v612_v18, %v610_v38  ;;  %v595_v43 = vpop.permute.xlu0 %594  ;;  %vm405_vm5 = vcmp.le.f32.partialorder %v1479_v12, 12.0 }
 0x114   : > { %v597_v44 = vsel %vm596_vm6, %v593_v19, %v595_v43  ;;  %v601_v45 = vsel %vm596_vm6, %v595_v43, %v593_v19  ;;  %v624_v46 = vmul.f32 %v620_v36, %v614_v41  ;;  %v625_v47 = vmul.f32 %v621_v37, %v618_v42 }
 0x115   : > { %v607_v50 = vmul.f32 %v603_v39, %v597_v44  ;;  %v608_v51 = vmul.f32 %v604_v40, %v601_v45  ;;  %v536_v36 = vperm.slane %v1197_v33, 1  ;;  %v1210_v43 = vsel %vm405_vm5, 1.0, %v1302_v22 }
 0x116   : > { %655 = vmatpush.msra.mxu2 %v624_v46  ;;  %675 = vmatpush.msra.mxu3 %v625_v47  ;;  %vm363_vm6 = vcmp.ge.f32.partialorder %v1430_v20, 4.0  ;;  %v799_v45 = vperm.slane %v1210_v43, 0  ;;  %v800_v46 = vperm.slane %v1210_v43, 1  ;;  %v445_v20 = vld [vmem:[%s1667_s9 + $0x8] sm:$0xff] }
 0x118   : > { %656 = vmatpush.msra.mxu2 %v607_v50  ;;  %676 = vmatpush.msra.mxu3 %v608_v51 }
 0x11a   : > { %v576_v54 = vpop.permute.xlu1 %575  ;;  %v1464_v61 = vpop.permute.xlu2 %940 }
 0x11b   : > { %v580_v55 = vsel %vm579_vm8, %v576_v54, %v578_v21  ;;  %v584_v56 = vsel %vm579_vm8, %v578_v21, %v576_v54  ;;  %v1458_v57 = vpop.permute.xlu0 %974  ;;  %vm792_vm8 = vcmask 654336  }
 0x11c   : > { %v590_v58 = vmul.f32 %v586_v52, %v580_v55  ;;  %v591_v59 = vmul.f32 %v587_v53, %v584_v56  ;;  %v1196_v55 = vsel %vm363_vm6, 1.0, %v1302_v22 }
 0x11e   : > { %657 = vmatpush.msra.mxu2 %v590_v58  ;;  %677 = vmatpush.msra.mxu3 %v591_v59 }
 0x120   : > { %658 = vmatpush.msra.mxu2 %v1382_v16  ;;  %678 = vmatpush.msra.mxu3 %v1384_v17 }
 0x122   : > { %v1468_v0 = vpop.permute.xlu1 %976  ;;  %v691_v6 = vpop.permute.xlu2 %690 }
 0x123   : > { %v562_v1 = vpop.permute.xlu0 %561 }
 0x124   : > { %v564_v2 = vsel %vm563_vm10, %v562_v1, %v559_v28  ;;  %v567_v3 = vsel %vm563_vm10, %v559_v28, %v562_v1  ;;  %vm402_vm10 = vcmp.le.f32.partialorder %v1479_v12, 13.0  ;;  %v519_v1 = vperm.slane %v1196_v55, 1 }
 0x125   : > { %v573_v4 = vmul.f32 %v569_v62, %v567_v3  ;;  %v574_v5 = vmul.f32 %v570_v63, %v564_v2  ;;  %v1209_v58 = vsel %vm402_vm10, 1.0, %v1302_v22  ;;  %v518_v63 = vperm.slane %v1196_v55, 0 }
 0x126   : > { %v782_v3 = vperm.slane %v1209_v58, 0 }
 0x127   : > { %659 = vmatpush.msra.mxu2 %v573_v4  ;;  %679 = vmatpush.msra.mxu3 %v574_v5  ;;  %v783_v4 = vperm.slane %v1209_v58, 1 }
 0x12a   : > { %v1470_v7 = vpop.permute.xlu1 %957  ;;  %v1483_v19 = vpop.permute.xlu2 %923 }
 0x12b   : > { %v542_v8 = vpop.permute.xlu0 %541 }
 0x132   : > { %v545_v13 = vpop.permute.xlu1 %544  ;;  %v791_v34 = vpop.permute.xlu2 %790 }
 0x133   : > { %v547_v14 = vsel %vm546_vm12, %v545_v13, %v542_v8  ;;  %v550_v15 = vsel %vm546_vm12, %v542_v8, %v545_v13  ;;  %v1481_v18 = vpop.permute.xlu0 %942  ;;  %vm432_vm12 = vmand %vm408_vm13, %vm363_vm6  ;;  %vm399_vm13 = vcmp.le.f32.partialorder %v1479_v12, 14.0 }
 0x134   : > { %v556_v21 = vmul.f32 %v552_v10, %v550_v15  ;;  %v557_v23 = vmul.f32 %v553_v11, %v547_v14  ;;  %v1219_v54 = vsel %vm432_vm12, 1.0, %v1302_v22  ;;  %vm423_vm6 = vmand %vm399_vm13, %vm372_vm9  ;;  %vm396_vm9 = vcmp.ge.f32.partialorder %v1479_v12, 1.0 }
 0x135   : > { %v985_v59 = vperm.slane %v1219_v54, 0  ;;  %v986_v60 = vperm.slane %v1219_v54, 1  ;;  %vm927_vm12 = vcmask 924672  }
 0x136   : > { %660 = vmatpush.msra.mxu2 %v556_v21  ;;  %680 = vmatpush.msra.mxu3 %v557_v23  ;;  %v1216_v21 = vsel %vm423_vm6, 1.0, %v1302_v22 }
 0x13a   : > { %v688_v27 = vpop.permute.xlu1 %687  ;;  %v772_v44 = vpop.permute.xlu2 %771 }
 0x13b   : > { %v1489_v28 = vsel %vm692_vm14, %v691_v6, %v688_v27  ;;  %v1491_v29 = vsel %vm692_vm14, %v688_v27, %v691_v6  ;;  %v525_v30 = vpop.permute.xlu0 %524  ;;  %vm429_vm14 = vmand %vm405_vm5, %vm366_vm15  ;;  %vm978_vm15 = vcmask 556032   ;;  %vm961_vm5 = vcmask 678912  }
 0x13c   : > { %v810_v31 = vmul.f32 %v806_v25, %v1489_v28  ;;  %v811_v32 = vmul.f32 %v807_v26, %v1491_v29  ;;  %v1218_v56 = vsel %vm429_vm14, 1.0, %v1302_v22  ;;  %v979_v6 = vsel %vm978_vm15, %v1458_v57, %v1468_v0  ;;  %vm420_vm14 = vmand %vm396_vm9, %vm375_vm7 }
 0x13d   : > { %v968_v2 = vperm.slane %v1218_v56, 0  ;;  %v969_v5 = vperm.slane %v1218_v56, 1  ;;  %v983_v8 = vsel %vm978_vm15, %v1468_v0, %v1458_v57  ;;  %v962_v57 = vsel %vm961_vm5, %v1470_v7, %v1456_v49 }
 0x13e   : > { %822 = vmatpush.msrb.mxu0 %v810_v31  ;;  %842 = vmatpush.msrb.mxu1 %v811_v32  ;;  %v966_v0 = vsel %vm961_vm5, %v1456_v49, %v1470_v7  ;;  %v989_v31 = vmul.f32 %v985_v59, %v979_v6  ;;  %v990_v32 = vmul.f32 %v986_v60, %v983_v8  ;;  %v934_v7 = vperm.slane %v1216_v21, 0 }
 0x13f   : > { %vm911_vm7 = vcmask 121856   ;;  %vm643_vm5 = vcmask 588800  }
 0x142   : > { %v528_v37 = vpop.permute.xlu1 %527  ;;  %v910_v9 = vpop.permute.xlu2 %909 }
 0x143   : > { %v530_v38 = vsel %vm529_vm2, %v528_v37, %v525_v30  ;;  %v533_v39 = vsel %vm529_vm2, %v525_v30, %v528_v37  ;;  %v1499_v40 = vpop.permute.xlu0 %925  ;;  %vm426_vm2 = vmand %vm402_vm10, %vm369_vm11  ;;  %vm512_vm11 = vcmask 31744   ;;  %vm944_vm10 = vcmask 801792  }
 0x144   : > { %v539_v41 = vmul.f32 %v535_v35, %v533_v39  ;;  %v540_v42 = vmul.f32 %v536_v36, %v530_v38  ;;  %v1217_v62 = vsel %vm426_vm2, 1.0, %v1302_v22  ;;  %v949_v49 = vsel %vm944_vm10, %v1481_v18, %v1464_v61 }
 0x145   : > { %v951_v11 = vperm.slane %v1217_v62, 0  ;;  %v952_v33 = vperm.slane %v1217_v62, 1  ;;  %v972_v35 = vmul.f32 %v968_v2, %v962_v57  ;;  %v973_v36 = vmul.f32 %v969_v5, %v966_v0 }
 0x146   : > { %661 = vmatpush.msra.mxu2 %v539_v41  ;;  %681 = vmatpush.msra.mxu3 %v540_v42  ;;  %v935_v37 = vperm.slane %v1216_v21, 1  ;;  %vm393_vm2 = vcmp.ge.f32.partialorder %v1479_v12, 2.0  ;;  %v928_v38 = vsel %vm927_vm12, %v1483_v19, %v1499_v40  ;;  %v932_v39 = vsel %vm927_vm12, %v1499_v40, %v1483_v19  ;;  %v436_v19 = vld [vmem:[%s1662_s4] sm:$0xf] }
 0x147   : > { %v956_v42 = vmul.f32 %v952_v33, %v949_v49  ;;  %vm1569_vm15 = vmand %vm393_vm2, %vm378_vm4  ;;  %vm758_vm4 = vcmask 916480   ;;  %vm742_vm12 = vcmask 130048  }
 0x14a   : > { %v789_v47 = vpop.permute.xlu1 %788  ;;  %v890_v40 = vpop.permute.xlu2 %889 }
 0x14b   : > { %v793_v48 = vsel %vm792_vm8, %v789_v47, %v791_v34  ;;  %v797_v50 = vsel %vm792_vm8, %v791_v34, %v789_v47  ;;  %v507_v51 = vpop.permute.xlu0 %506  ;;  %vm775_vm8 = vcmask 785408   ;;  %v945_v34 = vsel %vm944_vm10, %v1464_v61, %v1481_v18 }
 0x14c   : > { %v803_v52 = vmul.f32 %v799_v45, %v793_v48  ;;  %v804_v53 = vmul.f32 %v800_v46, %v797_v50  ;;  %v1215_v61 = vsel %vm420_vm14, 1.0, %v1302_v22  ;;  %v955_v41 = vmul.f32 %v951_v11, %v945_v34 }
 0x14d   : > { %v938_v45 = vmul.f32 %v934_v7, %v928_v38  ;;  %v939_v46 = vmul.f32 %v935_v37, %v932_v39  ;;  %v917_v47 = vperm.slane %v1215_v61, 0  ;;  %v918_v48 = vperm.slane %v1215_v61, 1 }
 0x14e   : > { %823 = vmatpush.msrb.mxu0 %v803_v52  ;;  %843 = vmatpush.msrb.mxu1 %v804_v53  ;;  %v1208_v52 = vsel %vm399_vm13, 1.0, %v1302_v22  ;;  %v1214_v53 = vsel %vm1569_vm15, 1.0, %v1302_v22  ;;  %vm894_vm13 = vcmask 244736  }
 0x14f   : > { %v765_v56 = vperm.slane %v1208_v52, 0  ;;  %v766_v58 = vperm.slane %v1208_v52, 1  ;;  %v900_v59 = vperm.slane %v1214_v53, 0  ;;  %v901_v60 = vperm.slane %v1214_v53, 1 }
 0x152   : > { %v511_v10 = vpop.permute.xlu1 %510  ;;  %v876_v11 = vpop.permute.xlu2 %875 }
 0x153   : > { %v513_v13 = vsel %vm512_vm11, %v511_v10, %v507_v51  ;;  %v516_v14 = vsel %vm512_vm11, %v507_v51, %v511_v10  ;;  %v774_v15 = vpop.permute.xlu0 %773  ;;  %vm390_vm11 = vcmp.ge.f32.partialorder %v1479_v12, 3.0 }
 0x154   : > { %v776_v23 = vsel %vm775_vm8, %v772_v44, %v774_v15  ;;  %v780_v24 = vsel %vm775_vm8, %v774_v15, %v772_v44  ;;  %v522_v25 = vmul.f32 %v518_v63, %v516_v14  ;;  %v523_v26 = vmul.f32 %v519_v1, %v513_v13  ;;  %vm414_vm6 = vmand %vm390_vm11, %vm381_vm3  ;;  %v443_v15 = vld [vmem:[%s1665_s7 + $0x8] sm:$0xff] }
 0x155   : > { %v786_v27 = vmul.f32 %v782_v3, %v776_v23  ;;  %v787_v30 = vmul.f32 %v783_v4, %v780_v24  ;;  %v1213_v10 = vsel %vm414_vm6, 1.0, %v1302_v22  ;;  %vm877_vm3 = vcmask 367616   ;;  %1050 = vperm.xlu2 %1270, %v443_v15  }
 0x156   : > { %662 = vmatpush.msra.mxu2 %v522_v25  ;;  %682 = vmatpush.msra.mxu3 %v523_v26  ;;  %v883_v13 = vperm.slane %v1213_v10, 0  ;;  %v884_v14 = vperm.slane %v1213_v10, 1  ;;  %vm387_vm8 = vcmp.ge.f32.partialorder %v1479_v12, 4.0  ;;  %v1207_v26 = vsel %vm396_vm9, 1.0, %v1302_v22 }
 0x157   : > { %824 = vmatpush.msrb.mxu0 %v786_v27  ;;  %844 = vmatpush.msrb.mxu1 %v787_v30  ;;  %vm411_vm10 = vmand %vm387_vm8, %vm384_vm1  ;;  %v748_v27 = vperm.slane %v1207_v26, 0  ;;  %v749_v30 = vperm.slane %v1207_v26, 1  ;;  %vm860_vm1 = vcmask 490496   ;;  %vm709_vm9 = vcmask 392192   ;;  %v439_v26 = vld [vmem:[%s1666_s8] sm:$0xff] }
 0x158   : > { %1001 = vmatpush.msrb.mxu2 %v989_v31  ;;  %1021 = vmatpush.msrb.mxu3 %v990_v32  ;;  %v1212_v57 = vsel %vm411_vm10, 1.0, %v1302_v22 }
 0x159   : > { %1222 = vmatmul.msk.f32.vlgmr.msra.gmra.mxu2 %vm643_vm5, %v436_v19  ;;  %1223 = vmatmul.msk.f32.vlgmr.msra.gmra.mxu3 %vm643_vm5, %v436_v19  ;;  %v866_v31 = vperm.slane %v1212_v57, 0  ;;  %v867_v32 = vperm.slane %v1212_v57, 1  ;;  %v440_v57 = vld [vmem:[%s1666_s8 + $0x8] sm:$0xff] }
 0x15a   : > { %1002 = vmatpush.msrb.mxu2 %v972_v35  ;;  %1022 = vmatpush.msrb.mxu3 %v973_v36  ;;  %v907_v18 = vpop.permute.xlu1 %906  ;;  %v856_v0 = vpop.permute.xlu2 %855 }
 0x15b   : > { %v755_v43 = vpop.permute.xlu0 %754  ;;  %v912_v50 = vsel %vm911_vm7, %v910_v9, %v907_v18  ;;  %v915_v51 = vsel %vm911_vm7, %v907_v18, %v910_v9  ;;  %v1206_v18 = vsel %vm393_vm2, 1.0, %v1302_v22 }
 0x15c   : > { %1003 = vmatpush.msrb.mxu2 %v955_v41  ;;  %1023 = vmatpush.msrb.mxu3 %v956_v42  ;;  %v921_v54 = vmul.f32 %v917_v47, %v915_v51  ;;  %v922_v55 = vmul.f32 %v918_v48, %v912_v50  ;;  %v438_v41 = vld [vmem:[%s1664_s6] sm:$0xff]  ;;  %v731_v42 = vperm.slane %v1206_v18, 0  ;;  %v1205_v48 = vsel %vm390_vm11, 1.0, %v1302_v22 }
 0x15d   : > { %1068 = vperm.xlu2 %1270, %v445_v20   ;;  %v1204_v50 = vsel %vm387_vm8, 1.0, %v1302_v22  ;;  %v715_v51 = vperm.slane %v1205_v48, 0  ;;  %v716_v52 = vperm.slane %v1205_v48, 1  ;;  %v437_v22 = vld [vmem:[%s1663_s5] sm:$0xf] }
 0x15e   : > { %1004 = vmatpush.msrb.mxu2 %v938_v45  ;;  %1024 = vmatpush.msrb.mxu3 %v939_v46 }
 0x160   : > { %1005 = vmatpush.msrb.mxu2 %v1382_v16  ;;  %1025 = vmatpush.msrb.mxu3 %v1384_v17 }
 0x162   : > { %1006 = vmatpush.msrb.mxu2 %v921_v54  ;;  %1026 = vmatpush.msrb.mxu3 %v922_v55  ;;  %v757_v62 = vpop.permute.xlu1 %756  ;;  %v725_v44 = vpop.permute.xlu2 %724  ;;  %v698_v55 = vperm.slane %v1204_v50, 0 }
 0x163   : > { %v759_v63 = vsel %vm758_vm4, %v755_v43, %v757_v62  ;;  %v763_v1 = vsel %vm758_vm4, %v757_v62, %v755_v43  ;;  %v893_v2 = vpop.permute.xlu0 %892  ;;  %v732_v43 = vperm.slane %v1206_v18, 1 }
 0x164   : > { %v895_v3 = vsel %vm894_vm13, %v893_v2, %v890_v40  ;;  %v898_v4 = vsel %vm894_vm13, %v890_v40, %v893_v2  ;;  %v769_v5 = vmul.f32 %v765_v56, %v759_v63  ;;  %v770_v6 = vmul.f32 %v766_v58, %v763_v1 }
 0x165   : > { %v904_v8 = vmul.f32 %v900_v59, %v898_v4  ;;  %v905_v9 = vmul.f32 %v901_v60, %v895_v3  ;;  %v699_v56 = vperm.slane %v1204_v50, 1  ;;  %v702_v63 = vmul.f32 %v698_v55, %v1491_v29  ;;  %v444_v3 = vld [vmem:[%s1667_s9] sm:$0xff] }
 0x166   : > { %825 = vmatpush.msrb.mxu0 %v769_v5  ;;  %845 = vmatpush.msrb.mxu1 %v770_v6 }
 0x167   : > { %1007 = vmatpush.msrb.mxu2 %v904_v8  ;;  %1027 = vmatpush.msrb.mxu3 %v905_v9  ;;  %v703_v1 = vmul.f32 %v699_v56, %v1489_v28 }
 0x168   : > { %826 = vmatpush.msrb.mxu0 %v1382_v16  ;;  %846 = vmatpush.msrb.mxu1 %v1384_v17 }
 0x169   : > { %1063 = vperm.xlu1 %1271, %v444_v3  }
 0x16a   : > { %v873_v21 = vpop.permute.xlu1 %872 }
 0x16b   : > { %v878_v23 = vsel %vm877_vm3, %v876_v11, %v873_v21  ;;  %v881_v16 = vsel %vm877_vm3, %v873_v21, %v876_v11  ;;  %v738_v24 = vpop.permute.xlu0 %737 }
 0x16c   : > { %v887_v17 = vmul.f32 %v883_v13, %v881_v16  ;;  %v888_v25 = vmul.f32 %v884_v14, %v878_v23 }
 0x16e   : > { %1008 = vmatpush.msrb.mxu2 %v887_v17  ;;  %1028 = vmatpush.msrb.mxu3 %v888_v25 }
 0x172   : > { %v741_v33 = vpop.permute.xlu1 %740 }
 0x173   : > { %v743_v34 = vsel %vm742_vm12, %v741_v33, %v738_v24  ;;  %v746_v49 = vsel %vm742_vm12, %v738_v24, %v741_v33  ;;  %v859_v7 = vpop.permute.xlu0 %858 }
 0x174   : > { %v861_v35 = vsel %vm860_vm1, %v859_v7, %v856_v0  ;;  %v864_v36 = vsel %vm860_vm1, %v856_v0, %v859_v7  ;;  %v752_v37 = vmul.f32 %v748_v27, %v746_v49  ;;  %v753_v38 = vmul.f32 %v749_v30, %v743_v34 }
 0x175   : > { %v870_v39 = vmul.f32 %v866_v31, %v864_v36  ;;  %v871_v61 = vmul.f32 %v867_v32, %v861_v35 }
 0x176   : > { %827 = vmatpush.msrb.mxu0 %v752_v37  ;;  %847 = vmatpush.msrb.mxu1 %v753_v38 }
 0x177   : > { %1009 = vmatpush.msrb.mxu2 %v870_v39  ;;  %1029 = vmatpush.msrb.mxu3 %v871_v61 }
 0x178   : > { %1226 = vmatmul.msk.f32.vlgmr.msrb.gmra.mxu2 %vm643_vm5, %v438_v41  ;;  %1227 = vmatmul.msk.f32.vlgmr.msrb.gmra.mxu3 %vm643_vm5, %v438_v41 }
 0x17a   : > { %v722_v19 = vpop.permute.xlu1 %721 }
 0x17b   : > { %v726_v40 = vsel %vm459_vm0, %v725_v44, %v722_v19  ;;  %v729_v45 = vsel %vm459_vm0, %v722_v19, %v725_v44  ;;  %v705_v53 = vpop.permute.xlu0 %704  ;;  %vm1040_vm0 = vcmask 1043456  }
 0x17c   : > { %v735_v46 = vmul.f32 %v731_v42, %v729_v45  ;;  %v736_v47 = vmul.f32 %v732_v43, %v726_v40 }
 0x17e   : > { %828 = vmatpush.msrb.mxu0 %v735_v46  ;;  %848 = vmatpush.msrb.mxu1 %v736_v47 }
 0x182   : > { %v708_v54 = vpop.permute.xlu1 %707 }
 0x183   : > { %v710_v58 = vsel %vm709_vm9, %v708_v54, %v705_v53  ;;  %v713_v59 = vsel %vm709_vm9, %v705_v53, %v708_v54  ;;  %v1046_v15 = vpop.permute.xlu0 %1045 }
 0x184   : > { %v719_v60 = vmul.f32 %v715_v51, %v713_v59  ;;  %v720_v62 = vmul.f32 %v716_v52, %v710_v58 }
 0x186   : > { %829 = vmatpush.msrb.mxu0 %v719_v60  ;;  %849 = vmatpush.msrb.mxu1 %v720_v62 }
 0x188   : > { %830 = vmatpush.msrb.mxu0 %v702_v63  ;;  %850 = vmatpush.msrb.mxu1 %v703_v1 }
 0x189   : > { %1224 = vmatmul.msk.f32.vlgmr.msrb.gmra.mxu0 %vm643_vm5, %v437_v22  ;;  %1225 = vmatmul.msk.f32.vlgmr.msrb.gmra.mxu1 %vm643_vm5, %v437_v22 }
 0x1af   : > { %v1051_v29 = vpop.permute.xlu2 %1050 }
 0x1b7   : > { %v1069_v34 = vpop.permute.xlu2 %1068 }
 0x1db   : > { %v1064_v20 = vpop.permute.xlu1 %1063 }
 0x1dc   : > { %v664_v12 = vpop.f32.mrf.mxu2  ;;  %v684_v2 = vpop.f32.mrf.mxu3 }
 0x1fb   : > { %v1011_v4 = vpop.f32.mrf.mxu2  ;;  %v1031_v28 = vpop.f32.mrf.mxu3 }
 0x1fc   : > { %v1055_v5 = vadd.f32 %v1051_v29, %v1011_v4  ;;  %v1056_v6 = vadd.f32 %v1051_v29, %v1031_v28 }
 0x1fe   : > { %v1059_v8 = vmax.f32 %v1055_v5, 0.0  ;;  %v1060_v9 = vmax.f32 %v1056_v6, 0.0 }
 0x200   : > { %1091 = vmatpush.msra.mxu0 %v1059_v8  ;;  %1114 = vmatpush.msra.mxu1 %v1060_v9 }
 0x206   : > { %v832_v10 = vpop.f32.mrf.mxu0  ;;  %v852_v11 = vpop.f32.mrf.mxu1 }
 0x207   : > { %v1036_v13 = vrot.slane %v832_v10, 4  ;;  %v1037_v14 = vrot.slane %v852_v11, 4 }
 0x209   : > { %v1041_v21 = vsel %vm1040_vm0, %v664_v12, %v1036_v13  ;;  %v1042_v23 = vsel %vm1040_vm0, %v684_v2, %v1037_v14 }
 0x20a   : > { %v1053_v16 = vadd.f32 %v1046_v15, %v1041_v21  ;;  %v1054_v24 = vadd.f32 %v1046_v15, %v1042_v23 }
 0x20c   : > { %v1057_v17 = vmax.f32 %v1053_v16, 0.0  ;;  %v1058_v25 = vmax.f32 %v1054_v24, 0.0 }
 0x20e   : > { %1092 = vmatpush.msra.mxu0 %v1057_v17  ;;  %1115 = vmatpush.msra.mxu1 %v1058_v25 }
 0x20f   : > { %1228 = vmatmul.msk.f32.vlgmr.msra.gmra.mxu0 %vm742_vm12, %v439_v26  ;;  %1230 = vmatmul.msk.f32.vlgmr.msra.gmra.mxu1 %vm742_vm12, %v439_v26 }
 0x217   : > { %1229 = vmatmul.msk.f32.gmra.mxu0 %vm742_vm12, %v440_v57  ;;  %1231 = vmatmul.msk.f32.gmra.mxu1 %vm742_vm12, %v440_v57 }
 0x28c   : > { %v1094_v0 = vpop.f32.mrf.mxu0  ;;  %v1117_v27 = vpop.f32.mrf.mxu1 }
 0x28d   : > { %v1095_v30 = vadd.f32 %v1094_v0, %v1064_v20  ;;  %v1118_v31 = vadd.f32 %v1117_v27, %v1064_v20 }
 0x28f   : > { %v1123_v32 = vmax.f32 %v1095_v30, 0.0  ;;  %v1124_v33 = vmax.f32 %v1118_v31, 0.0 }
 0x291   : > { %1127 = vst [vmem:[%s359_s17] sm:$0xff] %v1123_v32 }
 0x292   : > { %1128 = vst [vmem:[%s359_s17 + $0x8] sm:$0xff] %v1124_v33 }
 0x294   : > { %v1097_v49 = vpop.f32.mrf.mxu0  ;;  %v1120_v7 = vpop.f32.mrf.mxu1 }
 0x295   : > { %v1098_v35 = vadd.f32 %v1097_v49, %v1069_v34  ;;  %v1121_v36 = vadd.f32 %v1120_v7, %v1069_v34 }
 0x297   : > { %v1125_v37 = vmax.f32 %v1098_v35, 0.0  ;;  %v1126_v38 = vmax.f32 %v1121_v36, 0.0 }
 0x299   : > { %1129 = vst [vmem:[%s359_s17 + $0x10] sm:$0xff] %v1125_v37 }
 0x29a   : > { %1130 = vst [vmem:[%s359_s17 + $0x18] sm:$0xff] %v1126_v38 }
 0x29b PF: > { %s20_s13 = sadd.s32 1, %s1278_s13  }
 0x29c   : > { %p17_p4 = scmp.ge.s32.totalorder %s20_s13, 4  }
 0x29e   :  { %19 = sbr.rel (!%p17_p4) target bundleno = 1 (0x1), region = 91 }

</bundles_post_ra>
